<compile_context>
chip_gen: v6e
topology: v6e:2x2x1
jax: 0.10.0
libtpu: 0.0.40
codegen_flags: <defaults>
</compile_context>

<pallas_src>
import math
import jax
import jax.numpy as jnp
from jax import lax
from jax.experimental import pallas as pl
from jax.experimental.pallas import tpu as pltpu


def linhebb_fused_kernel(xs_ref, xcol_ref, w_ref, a_ref, h0_ref, b_ref,
                         ys_ref, h_ref):
    """All T recurrent LinHebb steps in one invocation; trace carried in the loop."""
    T, size_in = xs_ref.shape

    # Hoisted static term: wx_static[t] = x_t @ W^T as one M=T MXU matmul.
    wx_static = lax.dot_general(xs_ref[...], w_ref[...],
                                (((1,), (1,)), ((), ())),
                                preferred_element_type=jnp.float32)   # [T, Out]
    # Stash it in the output block; each row is consumed (then overwritten)
    # exactly at its own step, so no extra scratch is needed.
    ys_ref[...] = wx_static

    def step(t, h):
        x_row = xs_ref[pl.ds(t, 1), :]                        # [1, In]
        x_col = xcol_ref[pl.ds(t * size_in, size_in), :]      # [In, 1]

        # Plastic part of the matvec: x_t @ (A^T * H^T) == contract In on MXU.
        ah = a_ref[...] * h                                   # [Out, In]
        wx_dyn = lax.dot_general(x_row, ah, (((1,), (1,)), ((), ())),
                                 preferred_element_type=jnp.float32)  # [1, Out]
        wx = ys_ref[pl.ds(t, 1), :] + wx_dyn                  # add hoisted static term
        ys_ref[pl.ds(t, 1), :] = wx                           # bias added after the loop

        # Hebbian trace update (VPU broadcast multiply, no K=1 MXU op):
        # content H[r, c] <- 0.99 * H[r, c] + 0.01 * x[r] * wx[c]
        # (only shape-consistent with the [Out, In] buffer because In == Out,
        #  exactly as in the original module).
        return (1.0 - 0.01) * h + 0.01 * (x_col * wx)         # [In,1]*[1,Out] -> [In,Out]

    h_final = lax.fori_loop(0, T, step, h0_ref[...], unroll=True)
    h_ref[...] = h_final
    ys_ref[...] = ys_ref[...] + b_ref[...]                    # bias, once, whole block


def lin_hebb_forward_seq(xs, weights, alphas, hebbs, bias):
    """Run T recurrent LinHebb steps fused into a single pallas_call.

    xs:      [T, 1, size_in]       (B == 1, as the original module requires)
    weights: [size_out, size_in]
    alphas:  [size_out, size_in]
    hebbs:   [size_out, size_in]   initial hebbian trace (aliased to the output)
    bias:    [size_out]
    returns  (ys [T, 1, size_out], hebbs_new [size_out, size_in])
    """
    T, B, size_in = xs.shape
    size_out = weights.shape[0]
    assert B == 1 and size_in == size_out, \
        "original LinHebb hebb-update is only well-defined for B=1, square weights"

    xs2d = xs.reshape(T, size_in)                   # row layout, [T, In]
    xcol = xs.reshape(T * size_in, 1)               # same data viewed as stacked columns
    bias2d = bias.reshape(1, size_out)

    full = lambda i: (0, 0)
    ys2d, hebbs_new = pl.pallas_call(
        linhebb_fused_kernel,
        out_shape=(jax.ShapeDtypeStruct((T, size_out), jnp.float32),
                   jax.ShapeDtypeStruct((size_out, size_in), jnp.float32)),
        grid=(1,),
        in_specs=[
            pl.BlockSpec((T, size_in), full),                 # xs rows
            pl.BlockSpec((T * size_in, 1), full),             # xs as stacked columns
            pl.BlockSpec((size_out, size_in), full),          # weights
            pl.BlockSpec((size_out, size_in), full),          # alphas
            pl.BlockSpec((size_out, size_in), full),          # initial hebbs
            pl.BlockSpec((1, size_out), full),                # bias
        ],
        out_specs=(
            pl.BlockSpec((T, size_out), full),                # ys
            pl.BlockSpec((size_out, size_in), full),          # final hebbs
        ),
        # Donate the hebbs input buffer to the hebbs output (no fresh HBM alloc).
        input_output_aliases={4: 1},
        compiler_params=pltpu.CompilerParams(
            dimension_semantics=("arbitrary",)),
    )(xs2d, xcol, weights, alphas, hebbs, bias2d)
    return ys2d.reshape(T, 1, size_out), hebbs_new


def lin_hebb_forward(x, weights, alphas, hebbs, bias):
    """Single-step convenience wrapper (matches one call of the PyTorch forward)."""
    ys, hebbs_new = lin_hebb_forward_seq(x[None], weights, alphas, hebbs, bias)
    return ys[0], hebbs_new


def _reference_seq(xs, w, a, h, b):
    """Pure-JAX transcription of T sequential PyTorch forward calls (B == 1)."""
    hp = lax.Precision.HIGHEST
    ys = []
    for t in range(xs.shape[0]):
        x = xs[t]                                                  # [1, In]
        wx = jnp.dot(x, w.T + a.T * h.T, precision=hp)             # [1, Out]
        pre = x.reshape(x.shape[1], x.shape[0])                    # [In, 1]
        post = jnp.broadcast_to(wx, (x.shape[1], wx.shape[1]))     # [In, Out]
        h = (1.0 - 0.01) * h + 0.01 * (pre * post)
        ys.append(wx + b)
    return jnp.stack(ys), h


if __name__ == "__main__":
    size_in = size_out = 128      # lane-dense last dim (full 128-lane vregs)
    T = 8                         # recurrent steps, all fused into one kernel call
    B = 1

    key = jax.random.PRNGKey(0)
    k_x, k_w, k_a, k_b = jax.random.split(key, 4)

    # kaiming_uniform_(a=sqrt(5)) on an [out, in] matrix -> U(-1/sqrt(in), 1/sqrt(in));
    # bias bound is also 1/sqrt(fan_in).  hebbs starts at zero, as in __init__.
    bound = 1.0 / math.sqrt(size_in)
    weights = jax.random.uniform(k_w, (size_out, size_in), jnp.float32, -bound, bound)
    alphas  = jax.random.uniform(k_a, (size_out, size_in), jnp.float32, -bound, bound)
    bias    = jax.random.uniform(k_b, (size_out,), jnp.float32, -bound, bound)

    xs = jax.random.normal(k_x, (T, B, size_in), jnp.float32)

    # Reference (on its own zero trace; the kernel's hebbs buffer is donated).
    ys_ref, h_ref_final = _reference_seq(
        xs, weights, alphas, jnp.zeros((size_out, size_in), jnp.float32), bias)

    # Fused multi-step kernel.
    hebbs0 = jnp.zeros((size_out, size_in), jnp.float32)
    ys, hebbs_final = lin_hebb_forward_seq(xs, weights, alphas, hebbs0, bias)
    jax.block_until_ready((ys, hebbs_final))

    assert ys.shape == (T, B, size_out)
    assert jnp.allclose(ys, ys_ref, atol=1e-4, rtol=1e-4), "fused outputs mismatch"
    assert jnp.allclose(hebbs_final, h_ref_final, atol=1e-4, rtol=1e-4), \
        "fused final hebb mismatch"

    # Also exercise the single-step wrapper (one PyTorch forward call).
    y1, h1 = lin_hebb_forward(
        xs[0], weights, alphas, jnp.zeros((size_out, size_in), jnp.float32), bias)
    jax.block_until_ready((y1, h1))
    ys1_ref, h1_ref = _reference_seq(
        xs[:1], weights, alphas, jnp.zeros((size_out, size_in), jnp.float32), bias)
    assert jnp.allclose(y1, ys1_ref[0], atol=1e-4, rtol=1e-4), "1-step output mismatch"
    assert jnp.allclose(h1, h1_ref, atol=1e-4, rtol=1e-4), "1-step hebb mismatch"

    print("KERNEL_OK")
</pallas_src>

<mosaic_0001>
module attributes {stable_mosaic.version = 11 : i64} {
  func.func @linhebb_fused_kernel(%arg0: i32, %arg1: memref<8x128xf32, #tpu.memory_space<vmem>>, %arg2: memref<1024x1xf32, #tpu.memory_space<vmem>>, %arg3: memref<128x128xf32, #tpu.memory_space<vmem>>, %arg4: memref<128x128xf32, #tpu.memory_space<vmem>>, %arg5: memref<128x128xf32, #tpu.memory_space<vmem>>, %arg6: memref<1x128xf32, #tpu.memory_space<vmem>>, %arg7: memref<8x128xf32, #tpu.memory_space<vmem>>, %arg8: memref<128x128xf32, #tpu.memory_space<vmem>>) attributes {dimension_semantics = [#tpu.dimension_semantics<arbitrary>], iteration_bounds = array<i64: 1>, scalar_prefetch = 0 : i64, scratch_operands = 0 : i64, tpu.core_type = #tpu.core_type<tc>, window_params = [{pipeline_mode = #tpu.pipeline_mode<synchronous>, transform_indices = @transform_0, window_bounds = array<i64: 8, 128>}, {pipeline_mode = #tpu.pipeline_mode<synchronous>, transform_indices = @transform_1, window_bounds = array<i64: 1024, 1>}, {pipeline_mode = #tpu.pipeline_mode<synchronous>, transform_indices = @transform_2, window_bounds = array<i64: 128, 128>}, {pipeline_mode = #tpu.pipeline_mode<synchronous>, transform_indices = @transform_3, window_bounds = array<i64: 128, 128>}, {pipeline_mode = #tpu.pipeline_mode<synchronous>, transform_indices = @transform_4, window_bounds = array<i64: 128, 128>}, {pipeline_mode = #tpu.pipeline_mode<synchronous>, transform_indices = @transform_5, window_bounds = array<i64: 1, 128>}, {pipeline_mode = #tpu.pipeline_mode<synchronous>, transform_indices = @transform_6, window_bounds = array<i64: 8, 128>}, {pipeline_mode = #tpu.pipeline_mode<synchronous>, transform_indices = @transform_7, window_bounds = array<i64: 128, 128>}]} {
    %c0 = arith.constant 0 : index
    %c0_0 = arith.constant 0 : index
    %0 = vector.load %arg1[%c0, %c0_0] : memref<8x128xf32, #tpu.memory_space<vmem>>, vector<8x128xf32>
    %c0_1 = arith.constant 0 : index
    %c0_2 = arith.constant 0 : index
    %1 = vector.load %arg3[%c0_1, %c0_2] : memref<128x128xf32, #tpu.memory_space<vmem>>, vector<128x128xf32>
    %cst = arith.constant dense<0.000000e+00> : vector<8x128xf32>
    %2 = tpu.matmul %0, %1, %cst {dimension_numbers = #tpu.dot_dimension_numbers<[1], [1], [0], [0], [0, 0, 1, 0], [], []>} : vector<8x128xf32>, vector<128x128xf32>, vector<8x128xf32> -> vector<8x128xf32>
    %c0_3 = arith.constant 0 : index
    %c0_4 = arith.constant 0 : index
    %3 = vector.load %arg7[%c0_3, %c0_4] : memref<8x128xf32, #tpu.memory_space<vmem>>, vector<8x128xf32>
    tpu.vector_store %arg7[%c0_3, %c0_4], %2 {strides = array<i32>} : memref<8x128xf32, #tpu.memory_space<vmem>>, vector<8x128xf32>,
    %c0_5 = arith.constant 0 : index
    %c0_6 = arith.constant 0 : index
    %4 = vector.load %arg5[%c0_5, %c0_6] : memref<128x128xf32, #tpu.memory_space<vmem>>, vector<128x128xf32>
    %c0_i32 = arith.constant 0 : i32
    %5 = arith.index_cast %c0_i32 : i32 to index
    %c0_7 = arith.constant 0 : index
    %6 = vector.load %arg1[%5, %c0_7] : memref<8x128xf32, #tpu.memory_space<vmem>>, vector<1x128xf32>
    %c128_i32 = arith.constant 128 : i32
    %7 = arith.muli %c0_i32, %c128_i32 : i32
    %8 = arith.index_cast %7 : i32 to index
    %c0_8 = arith.constant 0 : index
    %9 = vector.load %arg2[%8, %c0_8] : memref<1024x1xf32, #tpu.memory_space<vmem>>, vector<128x1xf32>
    %c0_9 = arith.constant 0 : index
    %c0_10 = arith.constant 0 : index
    %10 = vector.load %arg4[%c0_9, %c0_10] : memref<128x128xf32, #tpu.memory_space<vmem>>, vector<128x128xf32>
    %11 = arith.mulf %10, %4 : vector<128x128xf32>
    %cst_11 = arith.constant dense<0.000000e+00> : vector<1x128xf32>
    %12 = tpu.matmul %6, %11, %cst_11 {dimension_numbers = #tpu.dot_dimension_numbers<[1], [1], [0], [0], [0, 0, 1, 0], [], []>} : vector<1x128xf32>, vector<128x128xf32>, vector<1x128xf32> -> vector<1x128xf32>
    %13 = arith.index_cast %c0_i32 : i32 to index
    %c0_12 = arith.constant 0 : index
    %14 = vector.load %arg7[%13, %c0_12] : memref<8x128xf32, #tpu.memory_space<vmem>>, vector<1x128xf32>
    %15 = arith.addf %14, %12 : vector<1x128xf32>
    %16 = arith.index_cast %c0_i32 : i32 to index
    %c0_13 = arith.constant 0 : index
    %17 = vector.load %arg7[%16, %c0_13] : memref<8x128xf32, #tpu.memory_space<vmem>>, vector<1x128xf32>
    tpu.vector_store %arg7[%16, %c0_13], %15 {strides = array<i32>} : memref<8x128xf32, #tpu.memory_space<vmem>>, vector<1x128xf32>,
    %cst_14 = arith.constant 9.900000e-01 : f32
    %18 = vector.broadcast %cst_14 : f32 to vector<128x128xf32>
    %19 = arith.mulf %18, %4 : vector<128x128xf32>
    %20 = vector.broadcast %9 : vector<128x1xf32> to vector<128x128xf32>
    %21 = vector.broadcast %15 : vector<1x128xf32> to vector<128x128xf32>
    %22 = arith.mulf %20, %21 : vector<128x128xf32>
    %cst_15 = arith.constant 0.00999999977 : f32
    %23 = vector.broadcast %cst_15 : f32 to vector<128x128xf32>
    %24 = arith.mulf %23, %22 : vector<128x128xf32>
    %25 = arith.addf %19, %24 : vector<128x128xf32>
    %c1_i32 = arith.constant 1 : i32
    %26 = arith.index_cast %c1_i32 : i32 to index
    %c0_16 = arith.constant 0 : index
    %27 = vector.load %arg1[%26, %c0_16] : memref<8x128xf32, #tpu.memory_space<vmem>>, vector<1x128xf32>
    %c128_i32_17 = arith.constant 128 : i32
    %28 = arith.muli %c1_i32, %c128_i32_17 : i32
    %29 = arith.index_cast %28 : i32 to index
    %c0_18 = arith.constant 0 : index
    %30 = vector.load %arg2[%29, %c0_18] : memref<1024x1xf32, #tpu.memory_space<vmem>>, vector<128x1xf32>
    %c0_19 = arith.constant 0 : index
    %c0_20 = arith.constant 0 : index
    %31 = vector.load %arg4[%c0_19, %c0_20] : memref<128x128xf32, #tpu.memory_space<vmem>>, vector<128x128xf32>
    %32 = arith.mulf %31, %25 : vector<128x128xf32>
    %cst_21 = arith.constant dense<0.000000e+00> : vector<1x128xf32>
    %33 = tpu.matmul %27, %32, %cst_21 {dimension_numbers = #tpu.dot_dimension_numbers<[1], [1], [0], [0], [0, 0, 1, 0], [], []>} : vector<1x128xf32>, vector<128x128xf32>, vector<1x128xf32> -> vector<1x128xf32>
    %34 = arith.index_cast %c1_i32 : i32 to index
    %c0_22 = arith.constant 0 : index
    %35 = vector.load %arg7[%34, %c0_22] : memref<8x128xf32, #tpu.memory_space<vmem>>, vector<1x128xf32>
    %36 = arith.addf %35, %33 : vector<1x128xf32>
    %37 = arith.index_cast %c1_i32 : i32 to index
    %c0_23 = arith.constant 0 : index
    %38 = vector.load %arg7[%37, %c0_23] : memref<8x128xf32, #tpu.memory_space<vmem>>, vector<1x128xf32>
    tpu.vector_store %arg7[%37, %c0_23], %36 {strides = array<i32>} : memref<8x128xf32, #tpu.memory_space<vmem>>, vector<1x128xf32>,
    %cst_24 = arith.constant 9.900000e-01 : f32
    %39 = vector.broadcast %cst_24 : f32 to vector<128x128xf32>
    %40 = arith.mulf %39, %25 : vector<128x128xf32>
    %41 = vector.broadcast %30 : vector<128x1xf32> to vector<128x128xf32>
    %42 = vector.broadcast %36 : vector<1x128xf32> to vector<128x128xf32>
    %43 = arith.mulf %41, %42 : vector<128x128xf32>
    %cst_25 = arith.constant 0.00999999977 : f32
    %44 = vector.broadcast %cst_25 : f32 to vector<128x128xf32>
    %45 = arith.mulf %44, %43 : vector<128x128xf32>
    %46 = arith.addf %40, %45 : vector<128x128xf32>
    %c2_i32 = arith.constant 2 : i32
    %47 = arith.index_cast %c2_i32 : i32 to index
    %c0_26 = arith.constant 0 : index
    %48 = vector.load %arg1[%47, %c0_26] : memref<8x128xf32, #tpu.memory_space<vmem>>, vector<1x128xf32>
    %c128_i32_27 = arith.constant 128 : i32
    %49 = arith.muli %c2_i32, %c128_i32_27 : i32
    %50 = arith.index_cast %49 : i32 to index
    %c0_28 = arith.constant 0 : index
    %51 = vector.load %arg2[%50, %c0_28] : memref<1024x1xf32, #tpu.memory_space<vmem>>, vector<128x1xf32>
    %c0_29 = arith.constant 0 : index
    %c0_30 = arith.constant 0 : index
    %52 = vector.load %arg4[%c0_29, %c0_30] : memref<128x128xf32, #tpu.memory_space<vmem>>, vector<128x128xf32>
    %53 = arith.mulf %52, %46 : vector<128x128xf32>
    %cst_31 = arith.constant dense<0.000000e+00> : vector<1x128xf32>
    %54 = tpu.matmul %48, %53, %cst_31 {dimension_numbers = #tpu.dot_dimension_numbers<[1], [1], [0], [0], [0, 0, 1, 0], [], []>} : vector<1x128xf32>, vector<128x128xf32>, vector<1x128xf32> -> vector<1x128xf32>
    %55 = arith.index_cast %c2_i32 : i32 to index
    %c0_32 = arith.constant 0 : index
    %56 = vector.load %arg7[%55, %c0_32] : memref<8x128xf32, #tpu.memory_space<vmem>>, vector<1x128xf32>
    %57 = arith.addf %56, %54 : vector<1x128xf32>
    %58 = arith.index_cast %c2_i32 : i32 to index
    %c0_33 = arith.constant 0 : index
    %59 = vector.load %arg7[%58, %c0_33] : memref<8x128xf32, #tpu.memory_space<vmem>>, vector<1x128xf32>
    tpu.vector_store %arg7[%58, %c0_33], %57 {strides = array<i32>} : memref<8x128xf32, #tpu.memory_space<vmem>>, vector<1x128xf32>,
    %cst_34 = arith.constant 9.900000e-01 : f32
    %60 = vector.broadcast %cst_34 : f32 to vector<128x128xf32>
    %61 = arith.mulf %60, %46 : vector<128x128xf32>
    %62 = vector.broadcast %51 : vector<128x1xf32> to vector<128x128xf32>
    %63 = vector.broadcast %57 : vector<1x128xf32> to vector<128x128xf32>
    %64 = arith.mulf %62, %63 : vector<128x128xf32>
    %cst_35 = arith.constant 0.00999999977 : f32
    %65 = vector.broadcast %cst_35 : f32 to vector<128x128xf32>
    %66 = arith.mulf %65, %64 : vector<128x128xf32>
    %67 = arith.addf %61, %66 : vector<128x128xf32>
    %c3_i32 = arith.constant 3 : i32
    %68 = arith.index_cast %c3_i32 : i32 to index
    %c0_36 = arith.constant 0 : index
    %69 = vector.load %arg1[%68, %c0_36] : memref<8x128xf32, #tpu.memory_space<vmem>>, vector<1x128xf32>
    %c128_i32_37 = arith.constant 128 : i32
    %70 = arith.muli %c3_i32, %c128_i32_37 : i32
    %71 = arith.index_cast %70 : i32 to index
    %c0_38 = arith.constant 0 : index
    %72 = vector.load %arg2[%71, %c0_38] : memref<1024x1xf32, #tpu.memory_space<vmem>>, vector<128x1xf32>
    %c0_39 = arith.constant 0 : index
    %c0_40 = arith.constant 0 : index
    %73 = vector.load %arg4[%c0_39, %c0_40] : memref<128x128xf32, #tpu.memory_space<vmem>>, vector<128x128xf32>
    %74 = arith.mulf %73, %67 : vector<128x128xf32>
    %cst_41 = arith.constant dense<0.000000e+00> : vector<1x128xf32>
    %75 = tpu.matmul %69, %74, %cst_41 {dimension_numbers = #tpu.dot_dimension_numbers<[1], [1], [0], [0], [0, 0, 1, 0], [], []>} : vector<1x128xf32>, vector<128x128xf32>, vector<1x128xf32> -> vector<1x128xf32>
    %76 = arith.index_cast %c3_i32 : i32 to index
    %c0_42 = arith.constant 0 : index
    %77 = vector.load %arg7[%76, %c0_42] : memref<8x128xf32, #tpu.memory_space<vmem>>, vector<1x128xf32>
    %78 = arith.addf %77, %75 : vector<1x128xf32>
    %79 = arith.index_cast %c3_i32 : i32 to index
    %c0_43 = arith.constant 0 : index
    %80 = vector.load %arg7[%79, %c0_43] : memref<8x128xf32, #tpu.memory_space<vmem>>, vector<1x128xf32>
    tpu.vector_store %arg7[%79, %c0_43], %78 {strides = array<i32>} : memref<8x128xf32, #tpu.memory_space<vmem>>, vector<1x128xf32>,
    %cst_44 = arith.constant 9.900000e-01 : f32
    %81 = vector.broadcast %cst_44 : f32 to vector<128x128xf32>
    %82 = arith.mulf %81, %67 : vector<128x128xf32>
    %83 = vector.broadcast %72 : vector<128x1xf32> to vector<128x128xf32>
    %84 = vector.broadcast %78 : vector<1x128xf32> to vector<128x128xf32>
    %85 = arith.mulf %83, %84 : vector<128x128xf32>
    %cst_45 = arith.constant 0.00999999977 : f32
    %86 = vector.broadcast %cst_45 : f32 to vector<128x128xf32>
    %87 = arith.mulf %86, %85 : vector<128x128xf32>
    %88 = arith.addf %82, %87 : vector<128x128xf32>
    %c4_i32 = arith.constant 4 : i32
    %89 = arith.index_cast %c4_i32 : i32 to index
    %c0_46 = arith.constant 0 : index
    %90 = vector.load %arg1[%89, %c0_46] : memref<8x128xf32, #tpu.memory_space<vmem>>, vector<1x128xf32>
    %c128_i32_47 = arith.constant 128 : i32
    %91 = arith.muli %c4_i32, %c128_i32_47 : i32
    %92 = arith.index_cast %91 : i32 to index
    %c0_48 = arith.constant 0 : index
    %93 = vector.load %arg2[%92, %c0_48] : memref<1024x1xf32, #tpu.memory_space<vmem>>, vector<128x1xf32>
    %c0_49 = arith.constant 0 : index
    %c0_50 = arith.constant 0 : index
    %94 = vector.load %arg4[%c0_49, %c0_50] : memref<128x128xf32, #tpu.memory_space<vmem>>, vector<128x128xf32>
    %95 = arith.mulf %94, %88 : vector<128x128xf32>
    %cst_51 = arith.constant dense<0.000000e+00> : vector<1x128xf32>
    %96 = tpu.matmul %90, %95, %cst_51 {dimension_numbers = #tpu.dot_dimension_numbers<[1], [1], [0], [0], [0, 0, 1, 0], [], []>} : vector<1x128xf32>, vector<128x128xf32>, vector<1x128xf32> -> vector<1x128xf32>
    %97 = arith.index_cast %c4_i32 : i32 to index
    %c0_52 = arith.constant 0 : index
    %98 = vector.load %arg7[%97, %c0_52] : memref<8x128xf32, #tpu.memory_space<vmem>>, vector<1x128xf32>
    %99 = arith.addf %98, %96 : vector<1x128xf32>
    %100 = arith.index_cast %c4_i32 : i32 to index
    %c0_53 = arith.constant 0 : index
    %101 = vector.load %arg7[%100, %c0_53] : memref<8x128xf32, #tpu.memory_space<vmem>>, vector<1x128xf32>
    tpu.vector_store %arg7[%100, %c0_53], %99 {strides = array<i32>} : memref<8x128xf32, #tpu.memory_space<vmem>>, vector<1x128xf32>,
    %cst_54 = arith.constant 9.900000e-01 : f32
    %102 = vector.broadcast %cst_54 : f32 to vector<128x128xf32>
    %103 = arith.mulf %102, %88 : vector<128x128xf32>
    %104 = vector.broadcast %93 : vector<128x1xf32> to vector<128x128xf32>
    %105 = vector.broadcast %99 : vector<1x128xf32> to vector<128x128xf32>
    %106 = arith.mulf %104, %105 : vector<128x128xf32>
    %cst_55 = arith.constant 0.00999999977 : f32
    %107 = vector.broadcast %cst_55 : f32 to vector<128x128xf32>
    %108 = arith.mulf %107, %106 : vector<128x128xf32>
    %109 = arith.addf %103, %108 : vector<128x128xf32>
    %c5_i32 = arith.constant 5 : i32
    %110 = arith.index_cast %c5_i32 : i32 to index
    %c0_56 = arith.constant 0 : index
    %111 = vector.load %arg1[%110, %c0_56] : memref<8x128xf32, #tpu.memory_space<vmem>>, vector<1x128xf32>
    %c128_i32_57 = arith.constant 128 : i32
    %112 = arith.muli %c5_i32, %c128_i32_57 : i32
    %113 = arith.index_cast %112 : i32 to index
    %c0_58 = arith.constant 0 : index
    %114 = vector.load %arg2[%113, %c0_58] : memref<1024x1xf32, #tpu.memory_space<vmem>>, vector<128x1xf32>
    %c0_59 = arith.constant 0 : index
    %c0_60 = arith.constant 0 : index
    %115 = vector.load %arg4[%c0_59, %c0_60] : memref<128x128xf32, #tpu.memory_space<vmem>>, vector<128x128xf32>
    %116 = arith.mulf %115, %109 : vector<128x128xf32>
    %cst_61 = arith.constant dense<0.000000e+00> : vector<1x128xf32>
    %117 = tpu.matmul %111, %116, %cst_61 {dimension_numbers = #tpu.dot_dimension_numbers<[1], [1], [0], [0], [0, 0, 1, 0], [], []>} : vector<1x128xf32>, vector<128x128xf32>, vector<1x128xf32> -> vector<1x128xf32>
    %118 = arith.index_cast %c5_i32 : i32 to index
    %c0_62 = arith.constant 0 : index
    %119 = vector.load %arg7[%118, %c0_62] : memref<8x128xf32, #tpu.memory_space<vmem>>, vector<1x128xf32>
    %120 = arith.addf %119, %117 : vector<1x128xf32>
    %121 = arith.index_cast %c5_i32 : i32 to index
    %c0_63 = arith.constant 0 : index
    %122 = vector.load %arg7[%121, %c0_63] : memref<8x128xf32, #tpu.memory_space<vmem>>, vector<1x128xf32>
    tpu.vector_store %arg7[%121, %c0_63], %120 {strides = array<i32>} : memref<8x128xf32, #tpu.memory_space<vmem>>, vector<1x128xf32>,
    %cst_64 = arith.constant 9.900000e-01 : f32
    %123 = vector.broadcast %cst_64 : f32 to vector<128x128xf32>
    %124 = arith.mulf %123, %109 : vector<128x128xf32>
    %125 = vector.broadcast %114 : vector<128x1xf32> to vector<128x128xf32>
    %126 = vector.broadcast %120 : vector<1x128xf32> to vector<128x128xf32>
    %127 = arith.mulf %125, %126 : vector<128x128xf32>
    %cst_65 = arith.constant 0.00999999977 : f32
    %128 = vector.broadcast %cst_65 : f32 to vector<128x128xf32>
    %129 = arith.mulf %128, %127 : vector<128x128xf32>
    %130 = arith.addf %124, %129 : vector<128x128xf32>
    %c6_i32 = arith.constant 6 : i32
    %131 = arith.index_cast %c6_i32 : i32 to index
    %c0_66 = arith.constant 0 : index
    %132 = vector.load %arg1[%131, %c0_66] : memref<8x128xf32, #tpu.memory_space<vmem>>, vector<1x128xf32>
    %c128_i32_67 = arith.constant 128 : i32
    %133 = arith.muli %c6_i32, %c128_i32_67 : i32
    %134 = arith.index_cast %133 : i32 to index
    %c0_68 = arith.constant 0 : index
    %135 = vector.load %arg2[%134, %c0_68] : memref<1024x1xf32, #tpu.memory_space<vmem>>, vector<128x1xf32>
    %c0_69 = arith.constant 0 : index
    %c0_70 = arith.constant 0 : index
    %136 = vector.load %arg4[%c0_69, %c0_70] : memref<128x128xf32, #tpu.memory_space<vmem>>, vector<128x128xf32>
    %137 = arith.mulf %136, %130 : vector<128x128xf32>
    %cst_71 = arith.constant dense<0.000000e+00> : vector<1x128xf32>
    %138 = tpu.matmul %132, %137, %cst_71 {dimension_numbers = #tpu.dot_dimension_numbers<[1], [1], [0], [0], [0, 0, 1, 0], [], []>} : vector<1x128xf32>, vector<128x128xf32>, vector<1x128xf32> -> vector<1x128xf32>
    %139 = arith.index_cast %c6_i32 : i32 to index
    %c0_72 = arith.constant 0 : index
    %140 = vector.load %arg7[%139, %c0_72] : memref<8x128xf32, #tpu.memory_space<vmem>>, vector<1x128xf32>
    %141 = arith.addf %140, %138 : vector<1x128xf32>
    %142 = arith.index_cast %c6_i32 : i32 to index
    %c0_73 = arith.constant 0 : index
    %143 = vector.load %arg7[%142, %c0_73] : memref<8x128xf32, #tpu.memory_space<vmem>>, vector<1x128xf32>
    tpu.vector_store %arg7[%142, %c0_73], %141 {strides = array<i32>} : memref<8x128xf32, #tpu.memory_space<vmem>>, vector<1x128xf32>,
    %cst_74 = arith.constant 9.900000e-01 : f32
    %144 = vector.broadcast %cst_74 : f32 to vector<128x128xf32>
    %145 = arith.mulf %144, %130 : vector<128x128xf32>
    %146 = vector.broadcast %135 : vector<128x1xf32> to vector<128x128xf32>
    %147 = vector.broadcast %141 : vector<1x128xf32> to vector<128x128xf32>
    %148 = arith.mulf %146, %147 : vector<128x128xf32>
    %cst_75 = arith.constant 0.00999999977 : f32
    %149 = vector.broadcast %cst_75 : f32 to vector<128x128xf32>
    %150 = arith.mulf %149, %148 : vector<128x128xf32>
    %151 = arith.addf %145, %150 : vector<128x128xf32>
    %c7_i32 = arith.constant 7 : i32
    %152 = arith.index_cast %c7_i32 : i32 to index
    %c0_76 = arith.constant 0 : index
    %153 = vector.load %arg1[%152, %c0_76] : memref<8x128xf32, #tpu.memory_space<vmem>>, vector<1x128xf32>
    %c128_i32_77 = arith.constant 128 : i32
    %154 = arith.muli %c7_i32, %c128_i32_77 : i32
    %155 = arith.index_cast %154 : i32 to index
    %c0_78 = arith.constant 0 : index
    %156 = vector.load %arg2[%155, %c0_78] : memref<1024x1xf32, #tpu.memory_space<vmem>>, vector<128x1xf32>
    %c0_79 = arith.constant 0 : index
    %c0_80 = arith.constant 0 : index
    %157 = vector.load %arg4[%c0_79, %c0_80] : memref<128x128xf32, #tpu.memory_space<vmem>>, vector<128x128xf32>
    %158 = arith.mulf %157, %151 : vector<128x128xf32>
    %cst_81 = arith.constant dense<0.000000e+00> : vector<1x128xf32>
    %159 = tpu.matmul %153, %158, %cst_81 {dimension_numbers = #tpu.dot_dimension_numbers<[1], [1], [0], [0], [0, 0, 1, 0], [], []>} : vector<1x128xf32>, vector<128x128xf32>, vector<1x128xf32> -> vector<1x128xf32>
    %160 = arith.index_cast %c7_i32 : i32 to index
    %c0_82 = arith.constant 0 : index
    %161 = vector.load %arg7[%160, %c0_82] : memref<8x128xf32, #tpu.memory_space<vmem>>, vector<1x128xf32>
    %162 = arith.addf %161, %159 : vector<1x128xf32>
    %163 = arith.index_cast %c7_i32 : i32 to index
    %c0_83 = arith.constant 0 : index
    %164 = vector.load %arg7[%163, %c0_83] : memref<8x128xf32, #tpu.memory_space<vmem>>, vector<1x128xf32>
    tpu.vector_store %arg7[%163, %c0_83], %162 {strides = array<i32>} : memref<8x128xf32, #tpu.memory_space<vmem>>, vector<1x128xf32>,
    %cst_84 = arith.constant 9.900000e-01 : f32
    %165 = vector.broadcast %cst_84 : f32 to vector<128x128xf32>
    %166 = arith.mulf %165, %151 : vector<128x128xf32>
    %167 = vector.broadcast %156 : vector<128x1xf32> to vector<128x128xf32>
    %168 = vector.broadcast %162 : vector<1x128xf32> to vector<128x128xf32>
    %169 = arith.mulf %167, %168 : vector<128x128xf32>
    %cst_85 = arith.constant 0.00999999977 : f32
    %170 = vector.broadcast %cst_85 : f32 to vector<128x128xf32>
    %171 = arith.mulf %170, %169 : vector<128x128xf32>
    %172 = arith.addf %166, %171 : vector<128x128xf32>
    %c8_i32 = arith.constant 8 : i32
    %c0_86 = arith.constant 0 : index
    %c0_87 = arith.constant 0 : index
    %173 = vector.load %arg8[%c0_86, %c0_87] : memref<128x128xf32, #tpu.memory_space<vmem>>, vector<128x128xf32>
    tpu.vector_store %arg8[%c0_86, %c0_87], %172 {strides = array<i32>} : memref<128x128xf32, #tpu.memory_space<vmem>>, vector<128x128xf32>,
    %c0_88 = arith.constant 0 : index
    %c0_89 = arith.constant 0 : index
    %174 = vector.load %arg7[%c0_88, %c0_89] : memref<8x128xf32, #tpu.memory_space<vmem>>, vector<8x128xf32>
    %c0_90 = arith.constant 0 : index
    %c0_91 = arith.constant 0 : index
    %175 = vector.load %arg6[%c0_90, %c0_91] : memref<1x128xf32, #tpu.memory_space<vmem>>, vector<1x128xf32>
    %176 = vector.broadcast %175 : vector<1x128xf32> to vector<8x128xf32>
    %177 = arith.addf %174, %176 : vector<8x128xf32>
    %c0_92 = arith.constant 0 : index
    %c0_93 = arith.constant 0 : index
    %178 = vector.load %arg7[%c0_92, %c0_93] : memref<8x128xf32, #tpu.memory_space<vmem>>, vector<8x128xf32>
    tpu.vector_store %arg7[%c0_92, %c0_93], %177 {strides = array<i32>} : memref<8x128xf32, #tpu.memory_space<vmem>>, vector<8x128xf32>,
    return
  }
  func.func @transform_0(%arg0: i32) -> (i32, i32) {
    %c0_i32 = arith.constant 0 : i32
    %c0_i32_0 = arith.constant 0 : i32
    %c0_i32_1 = arith.constant 0 : i32
    return %c0_i32, %c0_i32_0 : i32, i32
  }
  func.func @transform_1(%arg0: i32) -> (i32, i32) {
    %c0_i32 = arith.constant 0 : i32
    %c0_i32_0 = arith.constant 0 : i32
    %c0_i32_1 = arith.constant 0 : i32
    return %c0_i32, %c0_i32_0 : i32, i32
  }
  func.func @transform_2(%arg0: i32) -> (i32, i32) {
    %c0_i32 = arith.constant 0 : i32
    %c0_i32_0 = arith.constant 0 : i32
    %c0_i32_1 = arith.constant 0 : i32
    return %c0_i32, %c0_i32_0 : i32, i32
  }
  func.func @transform_3(%arg0: i32) -> (i32, i32) {
    %c0_i32 = arith.constant 0 : i32
    %c0_i32_0 = arith.constant 0 : i32
    %c0_i32_1 = arith.constant 0 : i32
    return %c0_i32, %c0_i32_0 : i32, i32
  }
  func.func @transform_4(%arg0: i32) -> (i32, i32) {
    %c0_i32 = arith.constant 0 : i32
    %c0_i32_0 = arith.constant 0 : i32
    %c0_i32_1 = arith.constant 0 : i32
    return %c0_i32, %c0_i32_0 : i32, i32
  }
  func.func @transform_5(%arg0: i32) -> (i32, i32) {
    %c0_i32 = arith.constant 0 : i32
    %c0_i32_0 = arith.constant 0 : i32
    %c0_i32_1 = arith.constant 0 : i32
    return %c0_i32, %c0_i32_0 : i32, i32
  }
  func.func @transform_6(%arg0: i32) -> (i32, i32) {
    %c0_i32 = arith.constant 0 : i32
    %c0_i32_0 = arith.constant 0 : i32
    %c0_i32_1 = arith.constant 0 : i32
    return %c0_i32, %c0_i32_0 : i32, i32
  }
  func.func @transform_7(%arg0: i32) -> (i32, i32) {
    %c0_i32 = arith.constant 0 : i32
    %c0_i32_0 = arith.constant 0 : i32
    %c0_i32_1 = arith.constant 0 : i32
    return %c0_i32, %c0_i32_0 : i32, i32
  }
}

</mosaic_0001>

<bundles_post_ra>
// kernel: tpu_custom_call.1
= control target key start
LH: loop header
LB: loop body
LE: loop exit
PB: predicated region body
PF: predicated region fallthrough
CT: control target
= control target key end

     0   :  { %13 = vsyncpa [#allocation3], 0  ;;  %s4720_s0 = inlined_call_operand.vmem [shape: f32[8,128], index: 0, kind: input, shape index: {}]   ;;  %s4721_s1 = inlined_call_operand.vmem [shape: f32[1024,1], index: 1, kind: input, shape index: {}]   ;;  %s4722_s2 = inlined_call_operand.vmem [shape: f32[128,128], index: 2, kind: input, shape index: {}]   ;;  %s4723_s3 = inlined_call_operand.vmem [shape: f32[128,128], index: 3, kind: input, shape index: {}]   ;;  %s4724_s4 = inlined_call_operand.hbm [shape: f32[128,128], index: 4, kind: input, shape index: {}, may-alias: {4,7}]   ;;  %s4725_s5 = inlined_call_operand.vmem [shape: f32[1,128], index: 5, kind: input, shape index: {}]   ;;  %s4726_s6 = inlined_call_operand.hbm [shape: f32[8,128], index: 6, kind: output, shape index: {0}]   ;;  %s4727_s7 = inlined_call_operand.hbm [shape: f32[128,128], index: 7, kind: output, shape index: {1}, may-alias: {4,7}]  }
   0x1   :  { %14 = vsyncpa [#allocation4], 0 }
   0x2   :  { %15 = vsyncpa [#allocation7], 0  ;;  %s2907_s24 = smov [#allocation2]  }
   0x3   :  { %s29_s25 = sshll.u32 %s2907_s24, 4  ;;  %s30_s25 = int_to_ptr.vmem [resolvable:$true] %s29_s25 }
   0x4   :  { %s2849_s26 = scalar_lea.vmem %s30_s25, 2048  ;;  %p2854_p1 = scmp.lt.s32.totalorder %s30_s25, %s30_s25 }
   0x5   :  { %p2850_p0 = scmp.ne.s32.totalorder %s30_s25, %s2849_s26  ;;  %p2855_p2 = scmp.lt.s32.totalorder %s2849_s26, %s2849_s26 }
   0x7   :  { %p2856_p3 = por %p2855_p2, %p2854_p1 }
   0x9   :  { %p2857_p4 = pnand %p2856_p3, %p2850_p0 }
   0xb   :  { %2860 = shalt.err (!%p2857_p4)
}
   0xc   :  { %s2908_s27 = smov 128   ;;  %s2909_s28 = smov 8  }
   0xd   :  { %35 = dma.hbm_to_vmem [thread:$0]  %s4724_s4, 2048, %s30_s25, [#allocation3], %s2908_s27, %s2908_s27, %s2909_s28  }
   0xe   :  { %2901 = dma.done.wait [#allocation3], 2048  }
   0xf   :  { %2902 = vsyncadd [#allocation3], 4294965248  ;;  %v2910_v0 = vmov 0   ;;  %v4728_v1 = vmov 0.0   ;;  %vm2912_vm0 = vmmov 0   ;;  %v161_v2 = vld [vmem:[%s4721_s1 + $0x78] sm:$0xff] }
  0x10   :  { %2840 = vset.pattern.permute.xlu1 %v2910_v0  ;;  %2839 = vset.pattern.permute.xlu0 %v2910_v0  ;;  %v159_v3 = vld [vmem:[%s4721_s1 + $0x68] sm:$0xff]  ;;  %v57_v4 = vld [vmem:[%s4722_s2 + $0x78] sm:$0xff]  ;;  %v160_v5 = vld [vmem:[%s4721_s1 + $0x70] sm:$0xff]  ;;  %s2913_s19 = smov [#allocation5]   ;;  %s2914_s21 = smov [#allocation6]  }
  0x11   :  { %2516 = vmatprep.subr.mxu0 %v4728_v1  ;;  %2551 = vmatprep.subr.mxu1 %v4728_v1  ;;  %v158_v6 = vld [vmem:[%s4721_s1 + $0x60] sm:$0xff]  ;;  %v2982_v7 = vld [vmem:[#allocation2 + $0x78] sm:$0xff]  ;;  %v56_v9 = vld [vmem:[%s4722_s2 + $0x70] sm:$0xff]  ;;  %s2337_s20 = sshll.u32 %s2913_s19, 4  ;;  %s4697_s22 = sshll.u32 %s2914_s21, 4  ;;  %s2338_s20 = int_to_ptr.vmem [resolvable:$true] %s2337_s20  ;;  %s2347_s22 = int_to_ptr.vmem [resolvable:$true] %s4697_s22 }
  0x12   :  { %2548 = vmatprep.mubr.msk.f32.mxu0 %vm2912_vm0, %v4728_v1  ;;  %2583 = vmatprep.mubr.msk.f32.mxu1 %vm2912_vm0, %v4728_v1  ;;  %v2987_v8 = vld [vmem:[%s4723_s3 + $0x78] sm:$0xff]  ;;  %v2995_v11 = vld [vmem:[#allocation2 + $0x70] sm:$0xff]  ;;  %v55_v16 = vld [vmem:[%s4722_s2 + $0x68] sm:$0xff]  ;;  %p2866_p6 = scmp.lt.s32.totalorder %s2338_s20, %s2338_s20 }
  0x13   :  { %360 = vperm.xlu0 %2839, %v161_v2   ;;  %350 = vperm.xlu1 %2840, %v159_v3   ;;  %v193_v10 = vmul.f32 %v2987_v8, %v2982_v7  ;;  %v3000_v12 = vld [vmem:[%s4723_s3 + $0x70] sm:$0xff]  ;;  %v157_v13 = vld [vmem:[%s4721_s1 + $0x58] sm:$0xff]  ;;  %v3015_v17 = vld [vmem:[#allocation2 + $0x68] sm:$0xff] }
  0x14   :  { %2517 = vmatpush3.xpose.msra.mxu0 %v57_v4  ;;  %v156_v14 = vld [vmem:[%s4721_s1 + $0x50] sm:$0xff]  ;;  %v192_v15 = vmul.f32 %v3000_v12, %v2995_v11  ;;  %v3020_v18 = vld [vmem:[%s4723_s3 + $0x68] sm:$0xff]  ;;  %v154_v20 = vld [vmem:[%s4721_s1 + $0x40] sm:$0xff] }
  0x15   :  { %2518 = vmatprep.subr.mxu0 %v4728_v1  ;;  %2552 = vmatpush3.xpose.msra.mxu1 %v193_v10  ;;  %v155_v19 = vld [vmem:[%s4721_s1 + $0x48] sm:$0xff]  ;;  %v191_v21 = vmul.f32 %v3020_v18, %v3015_v17  ;;  %v54_v22 = vld [vmem:[%s4722_s2 + $0x60] sm:$0xff]  ;;  %v153_v25 = vld [vmem:[%s4721_s1 + $0x38] sm:$0xff] }
  0x16   :  { %2553 = vmatprep.subr.mxu1 %v4728_v1  ;;  %v3035_v23 = vld [vmem:[#allocation2 + $0x60] sm:$0xff]  ;;  %v152_v26 = vld [vmem:[%s4721_s1 + $0x30] sm:$0xff]  ;;  %v53_v28 = vld [vmem:[%s4722_s2 + $0x58] sm:$0xff] }
  0x17   :  { %355 = vperm.xlu0 %2839, %v160_v5   ;;  %345 = vperm.xlu1 %2840, %v158_v6   ;;  %v3040_v24 = vld [vmem:[%s4723_s3 + $0x60] sm:$0xff]  ;;  %v3055_v29 = vld [vmem:[#allocation2 + $0x58] sm:$0xff]  ;;  %v151_v31 = vld [vmem:[%s4721_s1 + $0x28] sm:$0xff] }
  0x18   :  { %2519 = vmatpush3.xpose.msra.mxu0 %v56_v9  ;;  %v190_v27 = vmul.f32 %v3040_v24, %v3035_v23  ;;  %v3060_v30 = vld [vmem:[%s4723_s3 + $0x58] sm:$0xff]  ;;  %v150_v32 = vld [vmem:[%s4721_s1 + $0x20] sm:$0xff]  ;;  %v52_v34 = vld [vmem:[%s4722_s2 + $0x50] sm:$0xff] }
  0x19   :  { %2520 = vmatprep.subr.mxu0 %v4728_v1  ;;  %2554 = vmatpush3.xpose.msra.mxu1 %v192_v15  ;;  %v189_v33 = vmul.f32 %v3060_v30, %v3055_v29  ;;  %v3075_v35 = vld [vmem:[#allocation2 + $0x50] sm:$0xff]  ;;  %v149_v37 = vld [vmem:[%s4721_s1 + $0x18] sm:$0xff]  ;;  %v51_v40 = vld [vmem:[%s4722_s2 + $0x48] sm:$0xff] }
  0x1a   :  { %2555 = vmatprep.subr.mxu1 %v4728_v1  ;;  %v3080_v36 = vld [vmem:[%s4723_s3 + $0x50] sm:$0xff]  ;;  %v3095_v41 = vld [vmem:[#allocation2 + $0x48] sm:$0xff]  ;;  %v146_v44 = vld [vmem:[%s4721_s1] sm:$0xff] }
  0x1b   :  { %340 = vperm.xlu0 %2839, %v157_v13   ;;  %335 = vperm.xlu1 %2840, %v156_v14   ;;  %v148_v38 = vld [vmem:[%s4721_s1 + $0x10] sm:$0xff]  ;;  %v188_v39 = vmul.f32 %v3080_v36, %v3075_v35  ;;  %v3100_v42 = vld [vmem:[%s4723_s3 + $0x48] sm:$0xff]  ;;  %v50_v46 = vld [vmem:[%s4722_s2 + $0x40] sm:$0xff] }
  0x1c   :  { %2521 = vmatpush3.xpose.msra.mxu0 %v55_v16  ;;  %v147_v43 = vld [vmem:[%s4721_s1 + $0x8] sm:$0xff]  ;;  %v187_v45 = vmul.f32 %v3100_v42, %v3095_v41  ;;  %v3115_v47 = vld [vmem:[#allocation2 + $0x40] sm:$0xff]  ;;  %v431_v49 = vld [vmem:[%s4721_s1 + $0xf8] sm:$0xff] }
  0x1d   :  { %2522 = vmatprep.subr.mxu0 %v4728_v1  ;;  %2556 = vmatpush3.xpose.msra.mxu1 %v191_v21  ;;  %v3120_v48 = vld [vmem:[%s4723_s3 + $0x40] sm:$0xff]  ;;  %v430_v50 = vld [vmem:[%s4721_s1 + $0xf0] sm:$0xff]  ;;  %v49_v52 = vld [vmem:[%s4722_s2 + $0x38] sm:$0xff] }
  0x1e   :  { %2557 = vmatprep.subr.mxu1 %v4728_v1  ;;  %v186_v51 = vmul.f32 %v3120_v48, %v3115_v47  ;;  %v3135_v53 = vld [vmem:[#allocation2 + $0x38] sm:$0xff]  ;;  %v429_v55 = vld [vmem:[%s4721_s1 + $0xe8] sm:$0xff]  ;;  %v428_v56 = vld [vmem:[%s4721_s1 + $0xe0] sm:$0xff] }
  0x1f   :  { %330 = vperm.xlu0 %2839, %v155_v19   ;;  %325 = vperm.xlu1 %2840, %v154_v20   ;;  %v3140_v54 = vld [vmem:[%s4723_s3 + $0x38] sm:$0xff]  ;;  %v48_v58 = vld [vmem:[%s4722_s2 + $0x30] sm:$0xff]  ;;  %v47_v0 = vld [vmem:[%s4722_s2 + $0x28] sm:$0xff] }
  0x20   :  { %2523 = vmatpush3.xpose.msra.mxu0 %v54_v22  ;;  %v185_v57 = vmul.f32 %v3140_v54, %v3135_v53  ;;  %v3155_v59 = vld [vmem:[#allocation2 + $0x30] sm:$0xff]  ;;  %v427_v61 = vld [vmem:[%s4721_s1 + $0xd8] sm:$0xff]  ;;  %v3175_v2 = vld [vmem:[#allocation2 + $0x28] sm:$0xff] }
  0x21   :  { %2524 = vmatprep.subr.mxu0 %v4728_v1  ;;  %2558 = vmatpush3.xpose.msra.mxu1 %v190_v27  ;;  %v3160_v60 = vld [vmem:[%s4723_s3 + $0x30] sm:$0xff]  ;;  %v3180_v3 = vld [vmem:[%s4723_s3 + $0x28] sm:$0xff]  ;;  %v424_v5 = vld [vmem:[%s4721_s1 + $0xc0] sm:$0xff] }
  0x22   :  { %2559 = vmatprep.subr.mxu1 %v4728_v1  ;;  %v426_v62 = vld [vmem:[%s4721_s1 + $0xd0] sm:$0xff]  ;;  %v184_v63 = vmul.f32 %v3160_v60, %v3155_v59  ;;  %v425_v4 = vld [vmem:[%s4721_s1 + $0xc8] sm:$0xff]  ;;  %v183_v6 = vmul.f32 %v3180_v3, %v3175_v2  ;;  %v46_v9 = vld [vmem:[%s4722_s2 + $0x20] sm:$0xff] }
  0x23   :  { %320 = vperm.xlu0 %2839, %v153_v25   ;;  %315 = vperm.xlu1 %2840, %v152_v26   ;;  %v3195_v10 = vld [vmem:[#allocation2 + $0x20] sm:$0xff]  ;;  %v423_v14 = vld [vmem:[%s4721_s1 + $0xb8] sm:$0xff]  ;;  %v422_v15 = vld [vmem:[%s4721_s1 + $0xb0] sm:$0xff] }
  0x24   :  { %2525 = vmatpush3.xpose.msra.mxu0 %v53_v28  ;;  %v3200_v13 = vld [vmem:[%s4723_s3 + $0x20] sm:$0xff]  ;;  %v45_v19 = vld [vmem:[%s4722_s2 + $0x18] sm:$0xff]  ;;  %v421_v22 = vld [vmem:[%s4721_s1 + $0xa8] sm:$0xff] }
  0x25   :  { %2526 = vmatprep.subr.mxu0 %v4728_v1  ;;  %2560 = vmatpush3.xpose.msra.mxu1 %v189_v33  ;;  %v182_v16 = vmul.f32 %v3200_v13, %v3195_v10  ;;  %v3215_v20 = vld [vmem:[#allocation2 + $0x18] sm:$0xff]  ;;  %v420_v25 = vld [vmem:[%s4721_s1 + $0xa0] sm:$0xff]  ;;  %v44_v27 = vld [vmem:[%s4722_s2 + $0x10] sm:$0xff] }
  0x26   :  { %2561 = vmatprep.subr.mxu1 %v4728_v1  ;;  %v3220_v21 = vld [vmem:[%s4723_s3 + $0x18] sm:$0xff]  ;;  %v3235_v28 = vld [vmem:[#allocation2 + $0x10] sm:$0xff] }
  0x27   :  { %310 = vperm.xlu0 %2839, %v151_v31   ;;  %305 = vperm.xlu1 %2840, %v150_v32   ;;  %v181_v26 = vmul.f32 %v3220_v21, %v3215_v20  ;;  %v3240_v31 = vld [vmem:[%s4723_s3 + $0x10] sm:$0xff]  ;;  %v419_v32 = vld [vmem:[%s4721_s1 + $0x98] sm:$0xff] }
  0x28   :  { %2527 = vmatpush3.xpose.msra.mxu0 %v52_v34  ;;  %v418_v33 = vld [vmem:[%s4721_s1 + $0x90] sm:$0xff]  ;;  %v180_v34 = vmul.f32 %v3240_v31, %v3235_v28 }
  0x29   :  { %2528 = vmatprep.subr.mxu0 %v4728_v1  ;;  %2562 = vmatpush3.xpose.msra.mxu1 %v188_v39  ;;  %v3260_v39 = vld [vmem:[%s4723_s3 + $0x8] sm:$0xff] }
  0x2a   :  { %2563 = vmatprep.subr.mxu1 %v4728_v1 }
  0x2b   :  { %300 = vperm.xlu0 %2839, %v149_v37   ;;  %295 = vperm.xlu1 %2840, %v148_v38   ;;  %v43_v37 = vld [vmem:[%s4722_s2 + $0x8] sm:$0xff] }
  0x2c   :  { %2529 = vmatpush3.xpose.msra.mxu0 %v51_v40  ;;  %v3255_v38 = vld [vmem:[#allocation2 + $0x8] sm:$0xff] }
  0x2d   :  { %2530 = vmatprep.subr.mxu0 %v4728_v1  ;;  %2564 = vmatpush3.xpose.msra.mxu1 %v187_v45  ;;  %v417_v40 = vld [vmem:[%s4721_s1 + $0x88] sm:$0xff]  ;;  %v42_v45 = vld [vmem:[%s4722_s2] sm:$0xff] }
  0x2e   :  { %2565 = vmatprep.subr.mxu1 %v4728_v1 }
  0x2f   :  { %290 = vperm.xlu0 %2839, %v147_v43   ;;  %285 = vperm.xlu1 %2840, %v146_v44   ;;  %v416_v43 = vld [vmem:[%s4721_s1 + $0x80] sm:$0xff]  ;;  %v179_v44 = vmul.f32 %v3260_v39, %v3255_v38 }
  0x30   :  { %2531 = vmatpush3.xpose.msra.mxu0 %v50_v46  ;;  %v3275_v46 = vld [vmem:[#allocation2] sm:$0xff] }
  0x31   :  { %2532 = vmatprep.subr.mxu0 %v4728_v1  ;;  %2566 = vmatpush3.xpose.msra.mxu1 %v186_v51  ;;  %v701_v51 = vld [vmem:[%s4721_s1 + $0x178] sm:$0xff] }
  0x32   :  { %2567 = vmatprep.subr.mxu1 %v4728_v1 }
  0x33   :  { %630 = vperm.xlu0 %2839, %v431_v49   ;;  %625 = vperm.xlu1 %2840, %v430_v50   ;;  %v3280_v49 = vld [vmem:[%s4723_s3] sm:$0xff] }
  0x34   :  { %2533 = vmatpush3.xpose.msra.mxu0 %v49_v52  ;;  %v41_v50 = vld [vmem:[%s4720_s0] sm:$0xff]  ;;  %v178_v52 = vmul.f32 %v3280_v49, %v3275_v46 }
  0x35   :  { %2534 = vmatprep.subr.mxu0 %v4728_v1  ;;  %2568 = vmatpush3.xpose.msra.mxu1 %v185_v57  ;;  %v145_v57 = vld [vmem:[%s4720_s0] sm:$0x1] }
  0x36   :  { %2569 = vmatprep.subr.mxu1 %v4728_v1 }
  0x37   :  { %620 = vperm.xlu0 %2839, %v429_v55   ;;  %615 = vperm.xlu1 %2840, %v428_v56   ;;  %v700_v55 = vld [vmem:[%s4721_s1 + $0x170] sm:$0xff]  ;;  %v699_v56 = vld [vmem:[%s4721_s1 + $0x168] sm:$0xff] }
  0x38   :  { %2535 = vmatpush3.xpose.msra.mxu0 %v48_v58  ;;  %v698_v58 = vld [vmem:[%s4721_s1 + $0x160] sm:$0xff] }
  0x39   :  { %2536 = vmatprep.subr.mxu0 %v4728_v1  ;;  %2570 = vmatpush3.xpose.msra.mxu1 %v184_v63  ;;  %v695_v63 = vld [vmem:[%s4721_s1 + $0x148] sm:$0xff] }
  0x3a   :  { %2571 = vmatprep.subr.mxu1 %v4728_v1 }
  0x3b   :  { %610 = vperm.xlu0 %2839, %v427_v61   ;;  %605 = vperm.xlu1 %2840, %v426_v62   ;;  %v697_v61 = vld [vmem:[%s4721_s1 + $0x158] sm:$0xff]  ;;  %v696_v62 = vld [vmem:[%s4721_s1 + $0x150] sm:$0xff] }
  0x3c   :  { %2537 = vmatpush3.xpose.msra.mxu0 %v47_v0  ;;  %v694_v0 = vld [vmem:[%s4721_s1 + $0x140] sm:$0xff] }
  0x3d   :  { %2538 = vmatprep.subr.mxu0 %v4728_v1  ;;  %2572 = vmatpush3.xpose.msra.mxu1 %v183_v6  ;;  %v691_v6 = vld [vmem:[%s4721_s1 + $0x128] sm:$0xff] }
  0x3e   :  { %2573 = vmatprep.subr.mxu1 %v4728_v1 }
  0x3f   :  { %600 = vperm.xlu0 %2839, %v425_v4   ;;  %595 = vperm.xlu1 %2840, %v424_v5   ;;  %v693_v4 = vld [vmem:[%s4721_s1 + $0x138] sm:$0xff]  ;;  %v692_v5 = vld [vmem:[%s4721_s1 + $0x130] sm:$0xff] }
  0x40   :  { %2539 = vmatpush3.xpose.msra.mxu0 %v46_v9  ;;  %v690_v9 = vld [vmem:[%s4721_s1 + $0x120] sm:$0xff] }
  0x41   :  { %2540 = vmatprep.subr.mxu0 %v4728_v1  ;;  %2574 = vmatpush3.xpose.msra.mxu1 %v182_v16  ;;  %v687_v16 = vld [vmem:[%s4721_s1 + $0x108] sm:$0xff] }
  0x42   :  { %2575 = vmatprep.subr.mxu1 %v4728_v1 }
  0x43   :  { %590 = vperm.xlu0 %2839, %v423_v14   ;;  %585 = vperm.xlu1 %2840, %v422_v15   ;;  %v689_v14 = vld [vmem:[%s4721_s1 + $0x118] sm:$0xff]  ;;  %v688_v15 = vld [vmem:[%s4721_s1 + $0x110] sm:$0xff] }
  0x44   :  { %2541 = vmatpush3.xpose.msra.mxu0 %v45_v19  ;;  %v686_v19 = vld [vmem:[%s4721_s1 + $0x100] sm:$0xff] }
  0x45   :  { %2542 = vmatprep.subr.mxu0 %v4728_v1  ;;  %2576 = vmatpush3.xpose.msra.mxu1 %v181_v26  ;;  %v969_v26 = vld [vmem:[%s4721_s1 + $0x1e8] sm:$0xff] }
  0x46   :  { %2577 = vmatprep.subr.mxu1 %v4728_v1 }
  0x47   :  { %580 = vperm.xlu0 %2839, %v421_v22   ;;  %575 = vperm.xlu1 %2840, %v420_v25   ;;  %v971_v22 = vld [vmem:[%s4721_s1 + $0x1f8] sm:$0xff]  ;;  %v970_v25 = vld [vmem:[%s4721_s1 + $0x1f0] sm:$0xff] }
  0x48   :  { %2543 = vmatpush3.xpose.msra.mxu0 %v44_v27  ;;  %v968_v27 = vld [vmem:[%s4721_s1 + $0x1e0] sm:$0xff] }
  0x49   :  { %2544 = vmatprep.subr.mxu0 %v4728_v1  ;;  %2578 = vmatpush3.xpose.msra.mxu1 %v180_v34  ;;  %v965_v34 = vld [vmem:[%s4721_s1 + $0x1c8] sm:$0xff] }
  0x4a   :  { %2579 = vmatprep.subr.mxu1 %v4728_v1 }
  0x4b   :  { %570 = vperm.xlu0 %2839, %v419_v32   ;;  %565 = vperm.xlu1 %2840, %v418_v33   ;;  %v967_v32 = vld [vmem:[%s4721_s1 + $0x1d8] sm:$0xff]  ;;  %v966_v33 = vld [vmem:[%s4721_s1 + $0x1d0] sm:$0xff] }
  0x4c   :  { %2545 = vmatpush3.xpose.msra.mxu0 %v43_v37  ;;  %v964_v37 = vld [vmem:[%s4721_s1 + $0x1c0] sm:$0xff] }
  0x4d   :  { %2546 = vmatprep.subr.mxu0 %v4728_v1  ;;  %2580 = vmatpush3.xpose.msra.mxu1 %v179_v44  ;;  %v961_v44 = vld [vmem:[%s4721_s1 + $0x1a8] sm:$0xff] }
  0x4e   :  { %2581 = vmatprep.subr.mxu1 %v4728_v1 }
  0x4f   :  { %560 = vperm.xlu0 %2839, %v417_v40   ;;  %555 = vperm.xlu1 %2840, %v416_v43   ;;  %v963_v40 = vld [vmem:[%s4721_s1 + $0x1b8] sm:$0xff]  ;;  %v962_v43 = vld [vmem:[%s4721_s1 + $0x1b0] sm:$0xff] }
  0x50   :  { %2547 = vmatpush3.xpose.msra.mxu0 %v42_v45  ;;  %v960_v45 = vld [vmem:[%s4721_s1 + $0x1a0] sm:$0xff] }
  0x51   :  { %2586 = vmatprep.subr.mxu0 %v4728_v1  ;;  %2582 = vmatpush3.xpose.msra.mxu1 %v178_v52  ;;  %v957_v52 = vld [vmem:[%s4721_s1 + $0x188] sm:$0xff] }
  0x52   :  { %2621 = vmatprep.subr.mxu1 %v4728_v1 }
  0x53   :  { %2549 = vmatmul.mubr.f32.vlgmr.msra.gmra.mxu0 %v41_v50  ;;  %900 = vperm.xlu0 %2839, %v701_v51   ;;  %v959_v50 = vld [vmem:[%s4721_s1 + $0x198] sm:$0xff]  ;;  %v958_v51 = vld [vmem:[%s4721_s1 + $0x190] sm:$0xff] }
  0x54   :  { %895 = vperm.xlu1 %2840, %v700_v55   ;;  %2618 = vmatprep.mubr.msk.f32.mxu0 %vm2912_vm0, %v4728_v1  ;;  %v956_v55 = vld [vmem:[%s4721_s1 + $0x180] sm:$0xff] }
  0x55   :  { %2584 = vmatmul.mubr.f32.vlgmr.msra.gmra.mxu1 %v145_v57  ;;  %v1240_v57 = vld [vmem:[%s4721_s1 + $0x270] sm:$0xff] }
  0x56   :  { %2653 = vmatprep.mubr.msk.f32.mxu1 %vm2912_vm0, %v4728_v1 }
  0x57   :  { %890 = vperm.xlu0 %2839, %v699_v56   ;;  %v1241_v56 = vld [vmem:[%s4721_s1 + $0x278] sm:$0xff] }
  0x58   :  { %885 = vperm.xlu1 %2840, %v698_v58   ;;  %v1239_v58 = vld [vmem:[%s4721_s1 + $0x268] sm:$0xff] }
  0x5b   :  { %880 = vperm.xlu0 %2839, %v697_v61   ;;  %v1238_v61 = vld [vmem:[%s4721_s1 + $0x260] sm:$0xff] }
  0x5c   :  { %875 = vperm.xlu1 %2840, %v696_v62   ;;  %v1237_v62 = vld [vmem:[%s4721_s1 + $0x258] sm:$0xff] }
  0x5f   :  { %870 = vperm.xlu0 %2839, %v695_v63   ;;  %v1236_v63 = vld [vmem:[%s4721_s1 + $0x250] sm:$0xff] }
  0x60   :  { %865 = vperm.xlu1 %2840, %v694_v0   ;;  %v1235_v0 = vld [vmem:[%s4721_s1 + $0x248] sm:$0xff] }
  0x63   :  { %860 = vperm.xlu0 %2839, %v693_v4   ;;  %v1234_v4 = vld [vmem:[%s4721_s1 + $0x240] sm:$0xff] }
  0x64   :  { %855 = vperm.xlu1 %2840, %v692_v5   ;;  %v1233_v5 = vld [vmem:[%s4721_s1 + $0x238] sm:$0xff] }
  0x67   :  { %850 = vperm.xlu0 %2839, %v691_v6   ;;  %v1232_v6 = vld [vmem:[%s4721_s1 + $0x230] sm:$0xff] }
  0x68   :  { %845 = vperm.xlu1 %2840, %v690_v9   ;;  %v1231_v9 = vld [vmem:[%s4721_s1 + $0x228] sm:$0xff] }
  0x6b   :  { %840 = vperm.xlu0 %2839, %v689_v14   ;;  %v1230_v14 = vld [vmem:[%s4721_s1 + $0x220] sm:$0xff] }
  0x6c   :  { %835 = vperm.xlu1 %2840, %v688_v15   ;;  %v1229_v15 = vld [vmem:[%s4721_s1 + $0x218] sm:$0xff] }
  0x6f   :  { %830 = vperm.xlu0 %2839, %v687_v16   ;;  %v1228_v16 = vld [vmem:[%s4721_s1 + $0x210] sm:$0xff] }
  0x70   :  { %825 = vperm.xlu1 %2840, %v686_v19   ;;  %v1227_v19 = vld [vmem:[%s4721_s1 + $0x208] sm:$0xff] }
  0x73   :  { %1170 = vperm.xlu0 %2839, %v971_v22   ;;  %v1226_v22 = vld [vmem:[%s4721_s1 + $0x200] sm:$0xff] }
  0x74   :  { %1165 = vperm.xlu1 %2840, %v970_v25   ;;  %v1511_v25 = vld [vmem:[%s4721_s1 + $0x2f8] sm:$0xff] }
  0x77   :  { %1160 = vperm.xlu0 %2839, %v969_v26   ;;  %v1510_v26 = vld [vmem:[%s4721_s1 + $0x2f0] sm:$0xff] }
  0x78   :  { %1155 = vperm.xlu1 %2840, %v968_v27   ;;  %v1509_v27 = vld [vmem:[%s4721_s1 + $0x2e8] sm:$0xff] }
  0x7b   :  { %1150 = vperm.xlu0 %2839, %v967_v32   ;;  %v1508_v32 = vld [vmem:[%s4721_s1 + $0x2e0] sm:$0xff] }
  0x7c   :  { %1145 = vperm.xlu1 %2840, %v966_v33   ;;  %v1507_v33 = vld [vmem:[%s4721_s1 + $0x2d8] sm:$0xff] }
  0x7f   :  { %1140 = vperm.xlu0 %2839, %v965_v34   ;;  %v1506_v34 = vld [vmem:[%s4721_s1 + $0x2d0] sm:$0xff] }
  0x80   :  { %1135 = vperm.xlu1 %2840, %v964_v37  }
  0x83   :  { %1130 = vperm.xlu0 %2839, %v963_v40  }
  0x84   :  { %1125 = vperm.xlu1 %2840, %v962_v43   ;;  %v1505_v43 = vld [vmem:[%s4721_s1 + $0x2c8] sm:$0xff] }
  0x87   :  { %1120 = vperm.xlu0 %2839, %v961_v44   ;;  %v1504_v44 = vld [vmem:[%s4721_s1 + $0x2c0] sm:$0xff] }
  0x88   :  { %1115 = vperm.xlu1 %2840, %v960_v45   ;;  %v1503_v45 = vld [vmem:[%s4721_s1 + $0x2b8] sm:$0xff] }
  0x8b   :  { %1110 = vperm.xlu0 %2839, %v959_v50  }
  0x8c   :  { %1105 = vperm.xlu1 %2840, %v958_v51   ;;  %v1502_v51 = vld [vmem:[%s4721_s1 + $0x2b0] sm:$0xff] }
  0x8e   :  { %v3459_v37 = vpop.permute.xlu0 %360  ;;  %v3461_v40 = vpop.permute.xlu1 %350 }
  0x8f   :  { %1100 = vperm.xlu0 %2839, %v957_v52  }
  0x90   :  { %1095 = vperm.xlu1 %2840, %v956_v55   ;;  %v1501_v55 = vld [vmem:[%s4721_s1 + $0x2a8] sm:$0xff] }
  0x92   :  { %v3472_v50 = vpop.permute.xlu0 %355  ;;  %v3477_v52 = vpop.permute.xlu1 %345 }
  0x93   :  { %1440 = vperm.xlu0 %2839, %v1241_v56   ;;  %v1500_v56 = vld [vmem:[%s4721_s1 + $0x2a0] sm:$0xff] }
  0x94   :  { %1435 = vperm.xlu1 %2840, %v1240_v57  }
  0x96   :  { %v3485_v57 = vpop.permute.xlu0 %340 }
  0x97   :  { %1430 = vperm.xlu0 %2839, %v1239_v58   ;;  %v3487_v58 = vpop.permute.xlu1 %335 }
  0x98   :  { %1425 = vperm.xlu1 %2840, %v1238_v61   ;;  %v1499_v61 = vld [vmem:[%s4721_s1 + $0x298] sm:$0xff] }
  0x9b   :  { %1420 = vperm.xlu0 %2839, %v1237_v62   ;;  %v1498_v62 = vld [vmem:[%s4721_s1 + $0x290] sm:$0xff] }
  0x9c   :  { %1415 = vperm.xlu1 %2840, %v1236_v63   ;;  %v1497_v63 = vld [vmem:[%s4721_s1 + $0x288] sm:$0xff] }
  0x9f   :  { %1410 = vperm.xlu0 %2839, %v1235_v0   ;;  %v3498_v0 = vpop.permute.xlu0 %330 }
  0xa0   :  { %1405 = vperm.xlu1 %2840, %v1234_v4   ;;  %v1496_v4 = vld [vmem:[%s4721_s1 + $0x280] sm:$0xff] }
  0xa3   :  { %1400 = vperm.xlu0 %2839, %v1233_v5   ;;  %v3503_v5 = vpop.permute.xlu1 %325 }
  0xa4   :  { %1395 = vperm.xlu1 %2840, %v1232_v6   ;;  %v1781_v6 = vld [vmem:[%s4721_s1 + $0x378] sm:$0xff] }
  0xa7   :  { %1390 = vperm.xlu0 %2839, %v1231_v9   ;;  %v1780_v9 = vld [vmem:[%s4721_s1 + $0x370] sm:$0xff] }
  0xa8   :  { %1385 = vperm.xlu1 %2840, %v1230_v14   ;;  %v3511_v14 = vpop.permute.xlu0 %320 }
  0xab   :  { %1380 = vperm.xlu0 %2839, %v1229_v15   ;;  %v3513_v15 = vpop.permute.xlu1 %315 }
  0xac   :  { %1375 = vperm.xlu1 %2840, %v1228_v16   ;;  %v1779_v16 = vld [vmem:[%s4721_s1 + $0x368] sm:$0xff] }
  0xaf   :  { %1370 = vperm.xlu0 %2839, %v1227_v19   ;;  %v1778_v19 = vld [vmem:[%s4721_s1 + $0x360] sm:$0xff] }
  0xb0   :  { %1365 = vperm.xlu1 %2840, %v1226_v22   ;;  %v1777_v22 = vld [vmem:[%s4721_s1 + $0x358] sm:$0xff] }
  0xb3   :  { %1710 = vperm.xlu0 %2839, %v1511_v25   ;;  %v3524_v25 = vpop.permute.xlu0 %310 }
  0xb4   :  { %1705 = vperm.xlu1 %2840, %v1510_v26   ;;  %v1776_v26 = vld [vmem:[%s4721_s1 + $0x350] sm:$0xff] }
  0xb7   :  { %1700 = vperm.xlu0 %2839, %v1509_v27   ;;  %v3529_v27 = vpop.permute.xlu1 %305 }
  0xb8   :  { %1695 = vperm.xlu1 %2840, %v1508_v32   ;;  %v1775_v32 = vld [vmem:[%s4721_s1 + $0x348] sm:$0xff] }
  0xbb   :  { %1690 = vperm.xlu0 %2839, %v1507_v33   ;;  %v1774_v33 = vld [vmem:[%s4721_s1 + $0x340] sm:$0xff] }
  0xbc   :  { %1685 = vperm.xlu1 %2840, %v1506_v34   ;;  %v3537_v34 = vpop.permute.xlu0 %300 }
  0xbf   :  { %1680 = vperm.xlu0 %2839, %v1505_v43   ;;  %v3539_v43 = vpop.permute.xlu1 %295 }
  0xc0   :  { %1675 = vperm.xlu1 %2840, %v1504_v44   ;;  %v1773_v44 = vld [vmem:[%s4721_s1 + $0x338] sm:$0xff] }
  0xc3   :  { %1670 = vperm.xlu0 %2839, %v1503_v45   ;;  %v1772_v45 = vld [vmem:[%s4721_s1 + $0x330] sm:$0xff] }
  0xc4   :  { %1665 = vperm.xlu1 %2840, %v1502_v51   ;;  %v1771_v51 = vld [vmem:[%s4721_s1 + $0x328] sm:$0xff] }
  0xc7   :  { %1660 = vperm.xlu0 %2839, %v1501_v55   ;;  %v3550_v55 = vpop.permute.xlu0 %290 }
  0xc8   :  { %1655 = vperm.xlu1 %2840, %v1500_v56   ;;  %v1770_v56 = vld [vmem:[%s4721_s1 + $0x320] sm:$0xff] }
  0xcb   :  { %1650 = vperm.xlu0 %2839, %v1499_v61   ;;  %v3555_v61 = vpop.permute.xlu1 %285 }
  0xcc   :  { %1645 = vperm.xlu1 %2840, %v1498_v62   ;;  %v1769_v62 = vld [vmem:[%s4721_s1 + $0x318] sm:$0xff] }
  0xcf   :  { %1640 = vperm.xlu0 %2839, %v1497_v63   ;;  %v1768_v63 = vld [vmem:[%s4721_s1 + $0x310] sm:$0xff] }
  0xd0   :  { %1635 = vperm.xlu1 %2840, %v1496_v4   ;;  %v3563_v4 = vpop.permute.xlu0 %630 }
  0xd3   :  { %1980 = vperm.xlu0 %2839, %v1781_v6   ;;  %v3565_v6 = vpop.permute.xlu1 %625 }
  0xd4   :  { %1975 = vperm.xlu1 %2840, %v1780_v9   ;;  %v1767_v9 = vld [vmem:[%s4721_s1 + $0x308] sm:$0xff] }
  0xd7   :  { %1970 = vperm.xlu0 %2839, %v1779_v16   ;;  %v1766_v16 = vld [vmem:[%s4721_s1 + $0x300] sm:$0xff] }
  0xd8   :  { %1965 = vperm.xlu1 %2840, %v1778_v19   ;;  %v2036_v19 = vld [vmem:[%s4721_s1 + $0x380] sm:$0xff] }
  0xdb   :  { %1960 = vperm.xlu0 %2839, %v1777_v22   ;;  %v3576_v22 = vpop.permute.xlu0 %620 }
  0xdc   :  { %1955 = vperm.xlu1 %2840, %v1776_v26   ;;  %4730 = vst [vmem:[#allocation11_spill] sm:$0xff] %v3576_v22  ;;  %v2037_v26 = vld [vmem:[%s4721_s1 + $0x388] sm:$0xff] }
  0xdf   :  { %1950 = vperm.xlu0 %2839, %v1775_v32   ;;  %v3581_v32 = vpop.permute.xlu1 %615 }
  0xe0   :  { %1945 = vperm.xlu1 %2840, %v1774_v33   ;;  %4731 = vst [vmem:[#allocation12_spill] sm:$0xff] %v3581_v32  ;;  %v2038_v33 = vld [vmem:[%s4721_s1 + $0x390] sm:$0xff] }
  0xe3   :  { %1940 = vperm.xlu0 %2839, %v1773_v44   ;;  %v2039_v44 = vld [vmem:[%s4721_s1 + $0x398] sm:$0xff] }
  0xe4   :  { %1935 = vperm.xlu1 %2840, %v1772_v45   ;;  %v3589_v45 = vpop.permute.xlu0 %610 }
  0xe5   :  { %4732 = vst [vmem:[#allocation13_spill] sm:$0xff] %v3589_v45 }
  0xe7   :  { %1930 = vperm.xlu0 %2839, %v1771_v51   ;;  %v3591_v51 = vpop.permute.xlu1 %605 }
  0xe8   :  { %1925 = vperm.xlu1 %2840, %v1770_v56   ;;  %4733 = vst [vmem:[#allocation14_spill] sm:$0xff] %v3591_v51  ;;  %v2040_v56 = vld [vmem:[%s4721_s1 + $0x3a0] sm:$0xff] }
  0xeb   :  { %1920 = vperm.xlu0 %2839, %v1769_v62   ;;  %v2041_v62 = vld [vmem:[%s4721_s1 + $0x3a8] sm:$0xff] }
  0xec   :  { %1915 = vperm.xlu1 %2840, %v1768_v63   ;;  %v2042_v63 = vld [vmem:[%s4721_s1 + $0x3b0] sm:$0xff] }
  0xef   :  { %1910 = vperm.xlu0 %2839, %v1767_v9   ;;  %v3602_v9 = vpop.permute.xlu0 %600 }
  0xf0   :  { %1905 = vperm.xlu1 %2840, %v1766_v16   ;;  %4734 = vst [vmem:[#allocation15_spill] sm:$0xff] %v3602_v9  ;;  %v2043_v16 = vld [vmem:[%s4721_s1 + $0x3b8] sm:$0xff] }
  0xf3   :  { %2175 = vperm.xlu0 %2839, %v2036_v19   ;;  %v3607_v19 = vpop.permute.xlu1 %595 }
  0xf4   :  { %2180 = vperm.xlu1 %2840, %v2037_v26   ;;  %4735 = vst [vmem:[#allocation16_spill] sm:$0xff] %v3607_v19  ;;  %v2044_v26 = vld [vmem:[%s4721_s1 + $0x3c0] sm:$0xff] }
  0xf7   :  { %2185 = vperm.xlu0 %2839, %v2038_v33   ;;  %v2045_v33 = vld [vmem:[%s4721_s1 + $0x3c8] sm:$0xff] }
  0xf8   :  { %2190 = vperm.xlu1 %2840, %v2039_v44   ;;  %v3615_v44 = vpop.permute.xlu0 %590 }
  0xf9   :  { %4736 = vst [vmem:[#allocation17_spill] sm:$0xff] %v3615_v44  ;;  %v363_v44 = vlaneseq }
  0xfb   :  { %2195 = vperm.xlu0 %2839, %v2040_v56   ;;  %v3617_v56 = vpop.permute.xlu1 %585 }
  0xfc   :  { %2200 = vperm.xlu1 %2840, %v2041_v62   ;;  %4737 = vst [vmem:[#allocation18_spill] sm:$0xff] %v3617_v56  ;;  %v2046_v62 = vld [vmem:[%s4721_s1 + $0x3d0] sm:$0xff]  ;;  %v3628_v1 = vpop.permute.xlu0 %580 }
  0xfd   :  { %4738 = vst [vmem:[#allocation19_spill] sm:$0xff] %v3628_v1  ;;  %v2050_v56 = vld [vmem:[%s4721_s1 + $0x3f0] sm:$0xff] }
  0xff   :  { %2205 = vperm.xlu0 %2839, %v2042_v63   ;;  %v2047_v63 = vld [vmem:[%s4721_s1 + $0x3d8] sm:$0xff] }
 0x100   :  { %2210 = vperm.xlu1 %2840, %v2043_v16   ;;  %v2048_v16 = vld [vmem:[%s4721_s1 + $0x3e0] sm:$0xff] }
 0x103   :  { %2215 = vperm.xlu0 %2839, %v2044_v26   ;;  %v2049_v26 = vld [vmem:[%s4721_s1 + $0x3e8] sm:$0xff] }
 0x104   :  { %2220 = vperm.xlu1 %2840, %v2045_v33   ;;  %v3633_v33 = vpop.permute.xlu1 %575 }
 0x105   :  { %4739 = vst [vmem:[#allocation20_spill] sm:$0xff] %v3633_v33 }
 0x107   :  { %2225 = vperm.xlu0 %2839, %v2046_v62   ;;  %v2051_v62 = vld [vmem:[%s4721_s1 + $0x3f8] sm:$0xff] }
 0x108   :  { %2230 = vperm.xlu1 %2840, %v2047_v63   ;;  %v3641_v63 = vpop.permute.xlu0 %570  ;;  %v3643_v1 = vpop.permute.xlu1 %565 }
 0x10b   :  { %2235 = vperm.xlu0 %2839, %v2048_v16   ;;  %v364_v16 = vshrl.u32 %v363_v44, 7  ;;  %v281_v44 = vmul.f32 0.99, %v2995_v11  ;;  %v279_v11 = vmul.f32 0.99, %v3035_v23 }
 0x10c   :  { %2240 = vperm.xlu1 %2840, %v2049_v26  }
 0x10d   :  { %v3645_v51 = vsub.s32 0, %v364_v16 }
 0x10f   :  { %2245 = vperm.xlu0 %2839, %v2050_v56   ;;  %v282_v56 = vmul.f32 0.99, %v2982_v7 }
 0x110   :  { %2250 = vperm.xlu1 %2840, %v2051_v62  }
 0x113   :  { %v124_v19 = vpop.f32.mrf.mxu0 }
 0x114   :  { %128 = vst [vmem:[#allocation5] sm:$0xff] %v124_v19 }
 0x115   :  { %v2550_v33 = vpop.f32.mrf.mxu0  ;;  %v260_v26 = vpop.f32.mrf.mxu1 }
 0x117   :  { %v2585_v9 = vpop.f32.mrf.mxu1 }
 0x11b   :  { %v264_v45 = vld [vmem:[#allocation5] sm:$0x1] }
 0x11c   :  { %v265_v32 = vadd.f32 %v264_v45, %v260_v26 }
 0x11e   :  { %266 = vst [vmem:[#allocation5] sm:$0x1] %v265_v32  ;;  %v3648_v22 = vrot.slane %v265_v32, %v3645_v51  ;;  %v280_v32 = vmul.f32 0.99, %v3015_v17 }
 0x120   :  { %v382_v62 = vmul.f32 %v3648_v22, %v3459_v37  ;;  %v381_v19 = vmul.f32 %v3648_v22, %v3472_v50  ;;  %v380_v16 = vmul.f32 %v3648_v22, %v3461_v40  ;;  %v379_v50 = vmul.f32 %v3648_v22, %v3477_v52 }
 0x122   :  { %v398_v33 = vmul.f32 0.01, %v382_v62  ;;  %v397_v9 = vmul.f32 0.01, %v381_v19  ;;  %v396_v37 = vmul.f32 0.01, %v380_v16 }
 0x123   :  { %v4740_v62 = vmov 0.0   ;;  %v395_v17 = vmul.f32 0.01, %v379_v50  ;;  %v278_v19 = vmul.f32 0.99, %v3055_v29 }
 0x124   :  { %v3658_v45 = vadd.f32 %v398_v33, %v282_v56  ;;  %v3663_v26 = vadd.f32 %v397_v9, %v281_v44  ;;  %v3671_v56 = vadd.f32 %v396_v37, %v280_v32  ;;  %v277_v33 = vmul.f32 0.99, %v3075_v35 }
 0x125   :  { %v3679_v23 = vadd.f32 %v395_v17, %v279_v11  ;;  %v276_v16 = vmul.f32 0.99, %v3095_v41  ;;  %v274_v50 = vmul.f32 0.99, %v3135_v53 }
 0x126   :  { %v463_v7 = vmul.f32 %v3658_v45, %v2987_v8  ;;  %v462_v40 = vmul.f32 %v3663_v26, %v3000_v12  ;;  %v378_v8 = vmul.f32 %v3648_v22, %v3485_v57  ;;  %v461_v52 = vmul.f32 %v3671_v56, %v3020_v18 }
 0x127   :  { %v377_v12 = vmul.f32 %v3648_v22, %v3487_v58  ;;  %v460_v57 = vmul.f32 %v3679_v23, %v3040_v24  ;;  %v376_v18 = vmul.f32 %v3648_v22, %v3498_v0  ;;  %v375_v24 = vmul.f32 %v3648_v22, %v3503_v5 }
 0x128   :  { %2587 = vmatpush3.xpose.msra.mxu0 %v463_v7  ;;  %v394_v44 = vmul.f32 0.01, %v378_v8  ;;  %v275_v7 = vmul.f32 0.99, %v3115_v47  ;;  %v272_v8 = vmul.f32 0.99, %v3175_v2 }
 0x129   :  { %2588 = vmatprep.subr.mxu0 %v4740_v62  ;;  %v393_v9 = vmul.f32 0.01, %v377_v12  ;;  %v392_v32 = vmul.f32 0.01, %v376_v18  ;;  %v391_v37 = vmul.f32 0.01, %v375_v24 }
 0x12a   :  { %v3687_v29 = vadd.f32 %v394_v44, %v278_v19  ;;  %v270_v12 = vmul.f32 0.99, %v3215_v20  ;;  %v268_v18 = vmul.f32 0.99, %v3255_v38 }
 0x12b   :  { %v3695_v35 = vadd.f32 %v393_v9, %v277_v33  ;;  %v3703_v41 = vadd.f32 %v392_v32, %v276_v16  ;;  %v3711_v47 = vadd.f32 %v391_v37, %v275_v7 }
 0x12c   :  { %2589 = vmatpush3.xpose.msra.mxu0 %v462_v40  ;;  %v459_v58 = vmul.f32 %v3687_v29, %v3060_v30  ;;  %v374_v30 = vmul.f32 %v3648_v22, %v3511_v14  ;;  %v273_v40 = vmul.f32 0.99, %v3155_v59 }
 0x12d   :  { %2590 = vmatprep.subr.mxu0 %v4740_v62  ;;  %v458_v0 = vmul.f32 %v3695_v35, %v3080_v36  ;;  %v457_v5 = vmul.f32 %v3703_v41, %v3100_v42  ;;  %v373_v36 = vmul.f32 %v3648_v22, %v3513_v15  ;;  %v456_v14 = vmul.f32 %v3711_v47, %v3120_v48 }
 0x12e   :  { %v390_v11 = vmul.f32 0.01, %v374_v30  ;;  %v372_v42 = vmul.f32 %v3648_v22, %v3524_v25  ;;  %v371_v48 = vmul.f32 %v3648_v22, %v3529_v27  ;;  %v552_v30 = vmul.f32 0.99, %v3658_v45 }
 0x12f   :  { %v389_v17 = vmul.f32 0.01, %v373_v36 }
 0x130   :  { %2591 = vmatpush3.xpose.msra.mxu0 %v461_v52  ;;  %v3719_v53 = vadd.f32 %v390_v11, %v274_v50  ;;  %v388_v19 = vmul.f32 0.01, %v372_v42  ;;  %v271_v52 = vmul.f32 0.99, %v3195_v10  ;;  %v387_v44 = vmul.f32 0.01, %v371_v48 }
 0x131   :  { %2592 = vmatprep.subr.mxu0 %v4740_v62  ;;  %v3727_v59 = vadd.f32 %v389_v17, %v273_v40  ;;  %v4741_v11 = vld [vmem:[#allocation11_spill] sm:$0xff]  ;;  %v3796_v40 = vld [vmem:[%s4723_s3 + $0x78] sm:$0xff]  ;;  %v551_v17 = vmul.f32 0.99, %v3663_v26  ;;  %v4742_v42 = vld [vmem:[#allocation12_spill] sm:$0xff] }
 0x132   :  { %v455_v15 = vmul.f32 %v3719_v53, %v3140_v54  ;;  %v3735_v2 = vadd.f32 %v388_v19, %v272_v8  ;;  %v370_v54 = vmul.f32 %v3648_v22, %v3537_v34  ;;  %v3743_v10 = vadd.f32 %v387_v44, %v271_v52 }
 0x133   :  { %v454_v25 = vmul.f32 %v3727_v59, %v3160_v60  ;;  %v369_v60 = vmul.f32 %v3648_v22, %v3539_v43  ;;  %v550_v19 = vmul.f32 0.99, %v3671_v56 }
 0x134   :  { %2593 = vmatpush3.xpose.msra.mxu0 %v460_v57  ;;  %v453_v27 = vmul.f32 %v3735_v2, %v3180_v3  ;;  %v386_v33 = vmul.f32 0.01, %v370_v54  ;;  %v269_v57 = vmul.f32 0.99, %v3235_v28  ;;  %v452_v34 = vmul.f32 %v3743_v10, %v3200_v13  ;;  %v3823_v54 = vld [vmem:[%s4723_s3 + $0x68] sm:$0xff] }
 0x135   :  { %2594 = vmatprep.subr.mxu0 %v4740_v62  ;;  %v385_v9 = vmul.f32 0.01, %v369_v60  ;;  %v368_v3 = vmul.f32 %v3648_v22, %v3550_v55  ;;  %v367_v13 = vmul.f32 %v3648_v22, %v3555_v61  ;;  %v534_v61 = vld [vmem:[#allocation5 + $0x1] sm:$0x1] }
 0x136   :  { %v3751_v20 = vadd.f32 %v386_v33, %v270_v12  ;;  %v549_v12 = vmul.f32 0.99, %v3679_v23  ;;  %v4744_v60 = vld [vmem:[#allocation14_spill] sm:$0xff] }
 0x137   :  { %v3759_v28 = vadd.f32 %v385_v9, %v269_v57  ;;  %v384_v16 = vmul.f32 0.01, %v368_v3  ;;  %v383_v32 = vmul.f32 0.01, %v367_v13  ;;  %v548_v9 = vmul.f32 0.99, %v3687_v29 }
 0x138   :  { %2595 = vmatpush3.xpose.msra.mxu0 %v459_v58  ;;  %v451_v43 = vmul.f32 %v3751_v20, %v3220_v21  ;;  %v267_v58 = vmul.f32 0.99, %v3275_v46  ;;  %v3849_v13 = vld [vmem:[%s4723_s3 + $0x58] sm:$0xff] }
 0x139   :  { %2596 = vmatprep.subr.mxu0 %v4740_v62  ;;  %v450_v55 = vmul.f32 %v3759_v28, %v3240_v31  ;;  %v3767_v38 = vadd.f32 %v384_v16, %v268_v18  ;;  %v415_v31 = vld [vmem:[%s4720_s0 + $0x1] sm:$0x1] }
 0x13a   :  { %v3772_v24 = vadd.f32 %v383_v32, %v267_v58  ;;  %v547_v58 = vmul.f32 0.99, %v3695_v35 }
 0x13b   :  { %v449_v21 = vmul.f32 %v3767_v38, %v3260_v39 }
 0x13c   :  { %2597 = vmatpush3.xpose.msra.mxu0 %v458_v0  ;;  %v448_v46 = vmul.f32 %v3772_v24, %v3280_v49 }
 0x13d   :  { %2598 = vmatprep.subr.mxu0 %v4740_v62 }
 0x140   :  { %2599 = vmatpush3.xpose.msra.mxu0 %v457_v5 }
 0x141   :  { %2600 = vmatprep.subr.mxu0 %v4740_v62 }
 0x144   :  { %2601 = vmatpush3.xpose.msra.mxu0 %v456_v14 }
 0x145   :  { %2602 = vmatprep.subr.mxu0 %v4740_v62 }
 0x148   :  { %2603 = vmatpush3.xpose.msra.mxu0 %v455_v15  ;;  %v3810_v15 = vld [vmem:[%s4723_s3 + $0x70] sm:$0xff] }
 0x149   :  { %2604 = vmatprep.subr.mxu0 %v4740_v62 }
 0x14c   :  { %2605 = vmatpush3.xpose.msra.mxu0 %v454_v25  ;;  %v4743_v25 = vld [vmem:[#allocation13_spill] sm:$0xff] }
 0x14d   :  { %2606 = vmatprep.subr.mxu0 %v4740_v62 }
 0x150   :  { %2607 = vmatpush3.xpose.msra.mxu0 %v453_v27 }
 0x151   :  { %2608 = vmatprep.subr.mxu0 %v4740_v62 }
 0x154   :  { %2609 = vmatpush3.xpose.msra.mxu0 %v452_v34  ;;  %v3836_v34 = vld [vmem:[%s4723_s3 + $0x60] sm:$0xff] }
 0x155   :  { %2610 = vmatprep.subr.mxu0 %v4740_v62 }
 0x158   :  { %2611 = vmatpush3.xpose.msra.mxu0 %v451_v43  ;;  %v4745_v43 = vld [vmem:[#allocation15_spill] sm:$0xff] }
 0x159   :  { %2612 = vmatprep.subr.mxu0 %v4740_v62 }
 0x15c   :  { %2613 = vmatpush3.xpose.msra.mxu0 %v450_v55 }
 0x15d   :  { %2614 = vmatprep.subr.mxu0 %v4740_v62 }
 0x160   :  { %2615 = vmatpush3.xpose.msra.mxu0 %v449_v21  ;;  %v4746_v21 = vld [vmem:[#allocation16_spill] sm:$0xff] }
 0x161   :  { %2616 = vmatprep.subr.mxu0 %v4740_v62 }
 0x164   :  { %2617 = vmatpush3.xpose.msra.mxu0 %v448_v46 }
 0x165   :  { %2656 = vmatprep.subr.mxu0 %v4740_v62 }
 0x167   :  { %2619 = vmatmul.mubr.f32.vlgmr.msra.gmra.mxu0 %v415_v31  ;;  %v3862_v31 = vld [vmem:[%s4723_s3 + $0x50] sm:$0xff] }
 0x168   :  { %2688 = vmatprep.mubr.msk.f32.mxu0 %vm2912_vm0, %v4740_v62 }
 0x227   :  { %v530_v39 = vpop.f32.mrf.mxu0 }
 0x228   :  { %v535_v22 = vadd.f32 %v534_v61, %v530_v39  ;;  %v546_v39 = vmul.f32 0.99, %v3703_v41 }
 0x229   :  { %v2620_v7 = vpop.f32.mrf.mxu0 }
 0x22a   :  { %536 = vst [vmem:[#allocation5 + $0x1] sm:$0x1] %v535_v22  ;;  %v3784_v0 = vrot.slane %v535_v22, %v3645_v51  ;;  %v4747_v7 = vld [vmem:[#allocation17_spill] sm:$0xff] }
 0x22c   :  { %v652_v49 = vmul.f32 %v3784_v0, %v3563_v4  ;;  %v651_v37 = vmul.f32 %v3784_v0, %v3565_v6  ;;  %v650_v36 = vmul.f32 %v3784_v0, %v4741_v11  ;;  %v649_v8 = vmul.f32 %v3784_v0, %v4742_v42  ;;  %v4748_v11 = vld [vmem:[#allocation18_spill] sm:$0xff] }
 0x22d   :  { %v648_v44 = vmul.f32 %v3784_v0, %v4743_v25  ;;  %v647_v57 = vmul.f32 %v3784_v0, %v4744_v60  ;;  %v646_v16 = vmul.f32 %v3784_v0, %v4745_v43  ;;  %v645_v46 = vmul.f32 %v3784_v0, %v4746_v21 }
 0x22e   :  { %v668_v50 = vmul.f32 0.01, %v652_v49  ;;  %v667_v5 = vmul.f32 0.01, %v651_v37  ;;  %v666_v45 = vmul.f32 0.01, %v650_v36  ;;  %v644_v49 = vmul.f32 %v3784_v0, %v4747_v7 }
 0x22f   :  { %v665_v52 = vmul.f32 0.01, %v649_v8  ;;  %v664_v33 = vmul.f32 0.01, %v648_v44  ;;  %v663_v18 = vmul.f32 0.01, %v647_v57  ;;  %v643_v36 = vmul.f32 %v3784_v0, %v4748_v11 }
 0x230   :  { %v3798_v14 = vadd.f32 %v668_v50, %v552_v30  ;;  %v3803_v6 = vadd.f32 %v667_v5, %v551_v17  ;;  %v3816_v48 = vadd.f32 %v666_v45, %v550_v19  ;;  %v662_v32 = vmul.f32 0.01, %v646_v16  ;;  %v3875_v37 = vld [vmem:[%s4723_s3 + $0x48] sm:$0xff]  ;;  %v3888_v17 = vld [vmem:[%s4723_s3 + $0x40] sm:$0xff] }
 0x231   :  { %v3829_v27 = vadd.f32 %v665_v52, %v549_v12  ;;  %v3842_v3 = vadd.f32 %v664_v33, %v548_v9  ;;  %v3855_v55 = vadd.f32 %v663_v18, %v547_v58  ;;  %v661_v22 = vmul.f32 0.01, %v645_v46  ;;  %v4749_v8 = vld [vmem:[#allocation19_spill] sm:$0xff]  ;;  %v4750_v12 = vld [vmem:[#allocation20_spill] sm:$0xff] }
 0x232   :  { %v733_v4 = vmul.f32 %v3796_v40, %v3798_v14  ;;  %v732_v26 = vmul.f32 %v3810_v15, %v3803_v6  ;;  %v731_v56 = vmul.f32 %v3823_v54, %v3816_v48  ;;  %v3868_v61 = vadd.f32 %v662_v32, %v546_v39  ;;  %v3914_v33 = vld [vmem:[%s4723_s3 + $0x30] sm:$0xff]  ;;  %v3927_v18 = vld [vmem:[%s4723_s3 + $0x28] sm:$0xff] }
 0x233   :  { %v730_v23 = vmul.f32 %v3836_v34, %v3829_v27  ;;  %v729_v29 = vmul.f32 %v3849_v13, %v3842_v3  ;;  %v728_v35 = vmul.f32 %v3862_v31, %v3855_v55  ;;  %v545_v30 = vmul.f32 0.99, %v3711_v47 }
 0x234   :  { %2622 = vmatpush3.xpose.msra.mxu1 %v733_v4  ;;  %v727_v41 = vmul.f32 %v3875_v37, %v3868_v61  ;;  %v660_v5 = vmul.f32 0.01, %v644_v49  ;;  %v544_v4 = vmul.f32 0.99, %v3719_v53  ;;  %v659_v42 = vmul.f32 0.01, %v643_v36 }
 0x235   :  { %2623 = vmatprep.subr.mxu1 %v4740_v62  ;;  %v3881_v50 = vadd.f32 %v661_v22, %v545_v30  ;;  %v642_v19 = vmul.f32 %v3784_v0, %v4749_v8  ;;  %v543_v52 = vmul.f32 0.99, %v3727_v59  ;;  %v542_v60 = vmul.f32 0.99, %v3735_v2  ;;  %v3986_v8 = vld [vmem:[%s4723_s3] sm:$0xff] }
 0x236   :  { %v3894_v45 = vadd.f32 %v660_v5, %v544_v4  ;;  %v541_v43 = vmul.f32 0.99, %v3743_v10  ;;  %v540_v32 = vmul.f32 0.99, %v3751_v20  ;;  %v561_v10 = vpop.permute.xlu0 %560  ;;  %v539_v22 = vmul.f32 0.99, %v3759_v28  ;;  %v556_v20 = vpop.permute.xlu1 %555 }
 0x237   :  { %v726_v47 = vmul.f32 %v3888_v17, %v3881_v50  ;;  %v3907_v25 = vadd.f32 %v659_v42, %v543_v52  ;;  %v658_v44 = vmul.f32 0.01, %v642_v19  ;;  %v3964_v5 = vld [vmem:[%s4723_s3 + $0x10] sm:$0xff]  ;;  %v538_v11 = vmul.f32 0.99, %v3767_v38 }
 0x238   :  { %2624 = vmatpush3.xpose.msra.mxu1 %v732_v26  ;;  %v3901_v26 = vld [vmem:[%s4723_s3 + $0x38] sm:$0xff] }
 0x239   :  { %2625 = vmatprep.subr.mxu1 %v4740_v62  ;;  %v725_v53 = vmul.f32 %v3901_v26, %v3894_v45  ;;  %v724_v59 = vmul.f32 %v3914_v33, %v3907_v25  ;;  %v3920_v57 = vadd.f32 %v658_v44, %v542_v60  ;;  %v804_v44 = vld [vmem:[#allocation5 + $0x2] sm:$0x1] }
 0x23a   :  { %v901_v52 = vpop.permute.xlu0 %900 }
 0x23b   :  { %v723_v2 = vmul.f32 %v3927_v18, %v3920_v57 }
 0x23c   :  { %2626 = vmatpush3.xpose.msra.mxu1 %v731_v56  ;;  %v641_v56 = vmul.f32 %v3784_v0, %v4750_v12 }
 0x23d   :  { %2627 = vmatprep.subr.mxu1 %v4740_v62 }
 0x23e   :  { %v657_v9 = vmul.f32 0.01, %v641_v56 }
 0x240   :  { %2628 = vmatpush3.xpose.msra.mxu1 %v730_v23  ;;  %v640_v23 = vmul.f32 %v3784_v0, %v3641_v63  ;;  %v3933_v16 = vadd.f32 %v657_v9, %v541_v43  ;;  %v3940_v63 = vld [vmem:[%s4723_s3 + $0x20] sm:$0xff]  ;;  %v891_v43 = vpop.permute.xlu0 %890 }
 0x241   :  { %2629 = vmatprep.subr.mxu1 %v4740_v62 }
 0x242   :  { %v656_v58 = vmul.f32 0.01, %v640_v23  ;;  %v722_v21 = vmul.f32 %v3940_v63, %v3933_v16 }
 0x244   :  { %2630 = vmatpush3.xpose.msra.mxu1 %v729_v29  ;;  %v639_v29 = vmul.f32 %v3784_v0, %v3643_v1  ;;  %v3946_v46 = vadd.f32 %v656_v58, %v540_v32  ;;  %v3952_v1 = vld [vmem:[%s4723_s3 + $0x18] sm:$0xff] }
 0x245   :  { %2631 = vmatprep.subr.mxu1 %v4740_v62 }
 0x246   :  { %v655_v39 = vmul.f32 0.01, %v639_v29  ;;  %v721_v7 = vmul.f32 %v3952_v1, %v3946_v46 }
 0x248   :  { %2632 = vmatpush3.xpose.msra.mxu1 %v728_v35  ;;  %v638_v35 = vmul.f32 %v3784_v0, %v561_v10  ;;  %v3958_v49 = vadd.f32 %v655_v39, %v539_v22 }
 0x249   :  { %2633 = vmatprep.subr.mxu1 %v4740_v62 }
 0x24a   :  { %v654_v30 = vmul.f32 0.01, %v638_v35  ;;  %v720_v28 = vmul.f32 %v3964_v5, %v3958_v49 }
 0x24c   :  { %2634 = vmatpush3.xpose.msra.mxu1 %v727_v41  ;;  %v637_v41 = vmul.f32 %v3784_v0, %v556_v20  ;;  %v3970_v36 = vadd.f32 %v654_v30, %v538_v11  ;;  %v3975_v0 = vld [vmem:[%s4723_s3 + $0x8] sm:$0xff]  ;;  %v881_v30 = vpop.permute.xlu0 %880 }
 0x24d   :  { %2635 = vmatprep.subr.mxu1 %v4740_v62 }
 0x24e   :  { %v653_v4 = vmul.f32 0.01, %v637_v41  ;;  %v719_v38 = vmul.f32 %v3975_v0, %v3970_v36 }
 0x250   :  { %2636 = vmatpush3.xpose.msra.mxu1 %v726_v47  ;;  %v537_v47 = vmul.f32 0.99, %v3772_v24  ;;  %v685_v24 = vld [vmem:[%s4720_s0 + $0x2] sm:$0x1] }
 0x251   :  { %2637 = vmatprep.subr.mxu1 %v4740_v62 }
 0x252   :  { %v3981_v42 = vadd.f32 %v653_v4, %v537_v47  ;;  %v819_v4 = vmul.f32 0.99, %v3829_v27 }
 0x254   :  { %2638 = vmatpush3.xpose.msra.mxu1 %v725_v53  ;;  %v718_v19 = vmul.f32 %v3986_v8, %v3981_v42 }
 0x255   :  { %2639 = vmatprep.subr.mxu1 %v4740_v62 }
 0x258   :  { %2640 = vmatpush3.xpose.msra.mxu1 %v724_v59  ;;  %v896_v59 = vpop.permute.xlu1 %895 }
 0x259   :  { %2641 = vmatprep.subr.mxu1 %v4740_v62 }
 0x25c   :  { %2642 = vmatpush3.xpose.msra.mxu1 %v723_v2  ;;  %v822_v2 = vmul.f32 0.99, %v3798_v14  ;;  %v886_v39 = vpop.permute.xlu1 %885  ;;  %v820_v14 = vmul.f32 0.99, %v3816_v48 }
 0x25d   :  { %2643 = vmatprep.subr.mxu1 %v4740_v62 }
 0x260   :  { %2644 = vmatpush3.xpose.msra.mxu1 %v722_v21  ;;  %v821_v21 = vmul.f32 0.99, %v3803_v6  ;;  %v876_v47 = vpop.permute.xlu1 %875 }
 0x261   :  { %2645 = vmatprep.subr.mxu1 %v4740_v62 }
 0x264   :  { %2646 = vmatpush3.xpose.msra.mxu1 %v721_v7 }
 0x265   :  { %2647 = vmatprep.subr.mxu1 %v4740_v62 }
 0x268   :  { %2648 = vmatpush3.xpose.msra.mxu1 %v720_v28 }
 0x269   :  { %2649 = vmatprep.subr.mxu1 %v4740_v62 }
 0x26c   :  { %2650 = vmatpush3.xpose.msra.mxu1 %v719_v38 }
 0x26d   :  { %2651 = vmatprep.subr.mxu1 %v4740_v62 }
 0x270   :  { %2652 = vmatpush3.xpose.msra.mxu1 %v718_v19 }
 0x271   :  { %2691 = vmatprep.subr.mxu1 %v4740_v62 }
 0x273   :  { %2654 = vmatmul.mubr.f32.vlgmr.msra.gmra.mxu1 %v685_v24 }
 0x274   :  { %2723 = vmatprep.mubr.msk.f32.mxu1 %vm2912_vm0, %v4740_v62 }
 0x333   :  { %v800_v53 = vpop.f32.mrf.mxu1 }
 0x334   :  { %v805_v12 = vadd.f32 %v804_v44, %v800_v53  ;;  %v871_v53 = vpop.permute.xlu0 %870 }
 0x335   :  { %v2655_v56 = vpop.f32.mrf.mxu1 }
 0x336   :  { %806 = vst [vmem:[#allocation5 + $0x2] sm:$0x1] %v805_v12  ;;  %v3998_v60 = vrot.slane %v805_v12, %v3645_v51 }
 0x338   :  { %v922_v9 = vmul.f32 %v3998_v60, %v901_v52  ;;  %v921_v23 = vmul.f32 %v3998_v60, %v896_v59  ;;  %v920_v32 = vmul.f32 %v3998_v60, %v891_v43  ;;  %v919_v7 = vmul.f32 %v3998_v60, %v886_v39 }
 0x339   :  { %v918_v28 = vmul.f32 %v3998_v60, %v881_v30  ;;  %v917_v24 = vmul.f32 %v3998_v60, %v876_v47  ;;  %v818_v52 = vmul.f32 0.99, %v3842_v3  ;;  %v916_v56 = vmul.f32 %v3998_v60, %v871_v53 }
 0x33a   :  { %v938_v58 = vmul.f32 0.01, %v922_v9  ;;  %v937_v29 = vmul.f32 0.01, %v921_v23  ;;  %v936_v20 = vmul.f32 0.01, %v920_v32  ;;  %v866_v9 = vpop.permute.xlu1 %865 }
 0x33b   :  { %v935_v6 = vmul.f32 0.01, %v919_v7  ;;  %v934_v19 = vmul.f32 0.01, %v918_v28  ;;  %v933_v12 = vmul.f32 0.01, %v917_v24 }
 0x33c   :  { %v4004_v10 = vadd.f32 %v938_v58, %v822_v2  ;;  %v4009_v22 = vadd.f32 %v937_v29, %v821_v21  ;;  %v4016_v11 = vadd.f32 %v936_v20, %v820_v14  ;;  %v817_v59 = vmul.f32 0.99, %v3855_v55  ;;  %v861_v29 = vpop.permute.xlu0 %860 }
 0x33d   :  { %v4023_v38 = vadd.f32 %v935_v6, %v819_v4  ;;  %v4030_v44 = vadd.f32 %v934_v19, %v818_v52  ;;  %v932_v43 = vmul.f32 0.01, %v916_v56  ;;  %v915_v2 = vmul.f32 %v3998_v60, %v866_v9 }
 0x33e   :  { %v1003_v35 = vmul.f32 %v4004_v10, %v3796_v40  ;;  %v1002_v41 = vmul.f32 %v4009_v22, %v3810_v15  ;;  %v1001_v48 = vmul.f32 %v4016_v11, %v3823_v54  ;;  %v4037_v23 = vadd.f32 %v933_v12, %v817_v59  ;;  %v856_v20 = vpop.permute.xlu1 %855 }
 0x33f   :  { %v1000_v27 = vmul.f32 %v4023_v38, %v3836_v34  ;;  %v999_v3 = vmul.f32 %v4030_v44, %v3849_v13  ;;  %v816_v58 = vmul.f32 0.99, %v3868_v61  ;;  %v931_v21 = vmul.f32 0.01, %v915_v2 }
 0x340   :  { %2657 = vmatpush3.xpose.msra.mxu0 %v1003_v35  ;;  %v998_v55 = vmul.f32 %v4037_v23, %v3862_v31  ;;  %v914_v39 = vmul.f32 %v3998_v60, %v861_v29  ;;  %v815_v35 = vmul.f32 0.99, %v3881_v50  ;;  %v913_v30 = vmul.f32 %v3998_v60, %v856_v20  ;;  %v851_v6 = vpop.permute.xlu0 %850 }
 0x341   :  { %2658 = vmatprep.subr.mxu0 %v4740_v62  ;;  %v4044_v32 = vadd.f32 %v932_v43, %v816_v58  ;;  %v912_v47 = vmul.f32 %v3998_v60, %v851_v6 }
 0x342   :  { %v4051_v7 = vadd.f32 %v931_v21, %v815_v35  ;;  %v930_v14 = vmul.f32 0.01, %v914_v39  ;;  %v929_v4 = vmul.f32 0.01, %v913_v30  ;;  %v846_v19 = vpop.permute.xlu1 %845 }
 0x343   :  { %v997_v61 = vmul.f32 %v4044_v32, %v3875_v37  ;;  %v928_v52 = vmul.f32 0.01, %v912_v47  ;;  %v911_v53 = vmul.f32 %v3998_v60, %v846_v19 }
 0x344   :  { %2659 = vmatpush3.xpose.msra.mxu0 %v1002_v41  ;;  %v814_v41 = vmul.f32 0.99, %v3894_v45  ;;  %v996_v50 = vmul.f32 %v4051_v7, %v3888_v17  ;;  %v841_v12 = vpop.permute.xlu0 %840 }
 0x345   :  { %2660 = vmatprep.subr.mxu0 %v4740_v62  ;;  %v927_v59 = vmul.f32 0.01, %v911_v53  ;;  %v910_v9 = vmul.f32 %v3998_v60, %v841_v12  ;;  %v1074_v53 = vld [vmem:[#allocation5 + $0x3] sm:$0x1] }
 0x346   :  { %v4058_v28 = vadd.f32 %v930_v14, %v814_v41  ;;  %v836_v43 = vpop.permute.xlu1 %835 }
 0x347   :  { %v926_v58 = vmul.f32 0.01, %v910_v9  ;;  %v909_v29 = vmul.f32 %v3998_v60, %v836_v43 }
 0x348   :  { %2661 = vmatpush3.xpose.msra.mxu0 %v1001_v48  ;;  %v813_v48 = vmul.f32 0.99, %v3907_v25  ;;  %v995_v45 = vmul.f32 %v4058_v28, %v3901_v26  ;;  %v831_v21 = vpop.permute.xlu0 %830 }
 0x349   :  { %2662 = vmatprep.subr.mxu0 %v4740_v62  ;;  %v925_v35 = vmul.f32 0.01, %v909_v29  ;;  %v908_v20 = vmul.f32 %v3998_v60, %v831_v21 }
 0x34a   :  { %v4065_v24 = vadd.f32 %v929_v4, %v813_v48  ;;  %v826_v14 = vpop.permute.xlu1 %825  ;;  %v807_v48 = vmul.f32 0.99, %v3981_v42 }
 0x34b   :  { %v924_v41 = vmul.f32 0.01, %v908_v20  ;;  %v907_v6 = vmul.f32 %v3998_v60, %v826_v14 }
 0x34c   :  { %2663 = vmatpush3.xpose.msra.mxu0 %v1000_v27  ;;  %v812_v27 = vmul.f32 0.99, %v3920_v57  ;;  %v994_v25 = vmul.f32 %v4065_v24, %v3914_v33  ;;  %v1171_v42 = vpop.permute.xlu0 %1170 }
 0x34d   :  { %2664 = vmatprep.subr.mxu0 %v4740_v62  ;;  %v923_v47 = vmul.f32 0.01, %v907_v6 }
 0x34e   :  { %v4072_v56 = vadd.f32 %v928_v52, %v812_v27 }
 0x34f   :  { %v4106_v60 = vadd.f32 %v923_v47, %v807_v48  ;;  %v1089_v47 = vmul.f32 0.99, %v4023_v38 }
 0x350   :  { %2665 = vmatpush3.xpose.msra.mxu0 %v999_v3  ;;  %v811_v3 = vmul.f32 0.99, %v3933_v16  ;;  %v993_v57 = vmul.f32 %v4072_v56, %v3927_v18  ;;  %v1161_v43 = vpop.permute.xlu0 %1160 }
 0x351   :  { %2666 = vmatprep.subr.mxu0 %v4740_v62 }
 0x352   :  { %v4079_v2 = vadd.f32 %v927_v59, %v811_v3  ;;  %v1166_v59 = vpop.permute.xlu1 %1165 }
 0x354   :  { %2667 = vmatpush3.xpose.msra.mxu0 %v998_v55  ;;  %v810_v55 = vmul.f32 0.99, %v3946_v46  ;;  %v992_v16 = vmul.f32 %v4079_v2, %v3940_v63 }
 0x355   :  { %2668 = vmatprep.subr.mxu0 %v4740_v62 }
 0x356   :  { %v4086_v39 = vadd.f32 %v926_v58, %v810_v55 }
 0x358   :  { %2669 = vmatpush3.xpose.msra.mxu0 %v997_v61  ;;  %v809_v61 = vmul.f32 0.99, %v3958_v49  ;;  %v991_v46 = vmul.f32 %v4086_v39, %v3952_v1 }
 0x359   :  { %2670 = vmatprep.subr.mxu0 %v4740_v62 }
 0x35a   :  { %v4093_v30 = vadd.f32 %v925_v35, %v809_v61  ;;  %v1156_v35 = vpop.permute.xlu1 %1155 }
 0x35c   :  { %2671 = vmatpush3.xpose.msra.mxu0 %v996_v50  ;;  %v808_v50 = vmul.f32 0.99, %v3970_v36  ;;  %v990_v4 = vmul.f32 %v4093_v30, %v3964_v5  ;;  %v988_v36 = vmul.f32 %v4106_v60, %v3986_v8 }
 0x35d   :  { %2672 = vmatprep.subr.mxu0 %v4740_v62 }
 0x35e   :  { %v4100_v49 = vadd.f32 %v924_v41, %v808_v50  ;;  %v1151_v41 = vpop.permute.xlu0 %1150  ;;  %v1146_v48 = vpop.permute.xlu1 %1145 }
 0x360   :  { %2673 = vmatpush3.xpose.msra.mxu0 %v995_v45  ;;  %v989_v19 = vmul.f32 %v4100_v49, %v3975_v0  ;;  %v955_v45 = vld [vmem:[%s4720_s0 + $0x3] sm:$0x1] }
 0x361   :  { %2674 = vmatprep.subr.mxu0 %v4740_v62 }
 0x364   :  { %2675 = vmatpush3.xpose.msra.mxu0 %v994_v25 }
 0x365   :  { %2676 = vmatprep.subr.mxu0 %v4740_v62 }
 0x368   :  { %2677 = vmatpush3.xpose.msra.mxu0 %v993_v57  ;;  %v1092_v57 = vmul.f32 0.99, %v4004_v10  ;;  %v1090_v10 = vmul.f32 0.99, %v4016_v11 }
 0x369   :  { %2678 = vmatprep.subr.mxu0 %v4740_v62 }
 0x36c   :  { %2679 = vmatpush3.xpose.msra.mxu0 %v992_v16  ;;  %v1091_v16 = vmul.f32 0.99, %v4009_v22 }
 0x36d   :  { %2680 = vmatprep.subr.mxu0 %v4740_v62 }
 0x370   :  { %2681 = vmatpush3.xpose.msra.mxu0 %v991_v46 }
 0x371   :  { %2682 = vmatprep.subr.mxu0 %v4740_v62 }
 0x374   :  { %2683 = vmatpush3.xpose.msra.mxu0 %v990_v4 }
 0x375   :  { %2684 = vmatprep.subr.mxu0 %v4740_v62 }
 0x378   :  { %2685 = vmatpush3.xpose.msra.mxu0 %v989_v19 }
 0x379   :  { %2686 = vmatprep.subr.mxu0 %v4740_v62 }
 0x37c   :  { %2687 = vmatpush3.xpose.msra.mxu0 %v988_v36 }
 0x37d   :  { %2726 = vmatprep.subr.mxu0 %v4740_v62 }
 0x37f   :  { %2689 = vmatmul.mubr.f32.vlgmr.msra.gmra.mxu0 %v955_v45 }
 0x380   :  { %2758 = vmatprep.mubr.msk.f32.mxu0 %vm2912_vm0, %v4740_v62 }
 0x43f   :  { %v1070_v52 = vpop.f32.mrf.mxu0 }
 0x440   :  { %v1075_v27 = vadd.f32 %v1074_v53, %v1070_v52  ;;  %v1141_v52 = vpop.permute.xlu0 %1140 }
 0x441   :  { %v2690_v12 = vpop.f32.mrf.mxu0 }
 0x442   :  { %1076 = vst [vmem:[#allocation5 + $0x3] sm:$0x1] %v1075_v27  ;;  %v4118_v25 = vrot.slane %v1075_v27, %v3645_v51 }
 0x444   :  { %v1192_v9 = vmul.f32 %v4118_v25, %v1171_v42  ;;  %v1191_v3 = vmul.f32 %v4118_v25, %v1166_v59  ;;  %v1190_v55 = vmul.f32 %v4118_v25, %v1161_v43  ;;  %v1189_v46 = vmul.f32 %v4118_v25, %v1156_v35 }
 0x445   :  { %v1188_v4 = vmul.f32 %v4118_v25, %v1151_v41  ;;  %v1187_v45 = vmul.f32 %v4118_v25, %v1146_v48  ;;  %v1088_v42 = vmul.f32 0.99, %v4030_v44  ;;  %v1186_v12 = vmul.f32 %v4118_v25, %v1141_v52 }
 0x446   :  { %v1208_v58 = vmul.f32 0.01, %v1192_v9  ;;  %v1207_v29 = vmul.f32 0.01, %v1191_v3  ;;  %v1206_v14 = vmul.f32 0.01, %v1190_v55  ;;  %v1136_v9 = vpop.permute.xlu1 %1135 }
 0x447   :  { %v1205_v22 = vmul.f32 0.01, %v1189_v46  ;;  %v1204_v36 = vmul.f32 0.01, %v1188_v4  ;;  %v1203_v27 = vmul.f32 0.01, %v1187_v45 }
 0x448   :  { %v4124_v21 = vadd.f32 %v1208_v58, %v1092_v57  ;;  %v4129_v61 = vadd.f32 %v1207_v29, %v1091_v16  ;;  %v4136_v50 = vadd.f32 %v1206_v14, %v1090_v10  ;;  %v1087_v59 = vmul.f32 0.99, %v4037_v23  ;;  %v1131_v29 = vpop.permute.xlu0 %1130 }
 0x449   :  { %v4143_v19 = vadd.f32 %v1205_v22, %v1089_v47  ;;  %v4150_v53 = vadd.f32 %v1204_v36, %v1088_v42  ;;  %v1202_v43 = vmul.f32 0.01, %v1186_v12  ;;  %v1185_v57 = vmul.f32 %v4118_v25, %v1136_v9 }
 0x44a   :  { %v1273_v20 = vmul.f32 %v4124_v21, %v3796_v40  ;;  %v1272_v6 = vmul.f32 %v4129_v61, %v3810_v15  ;;  %v1271_v11 = vmul.f32 %v4136_v50, %v3823_v54  ;;  %v4157_v3 = vadd.f32 %v1203_v27, %v1087_v59  ;;  %v1126_v14 = vpop.permute.xlu1 %1125 }
 0x44b   :  { %v1270_v38 = vmul.f32 %v4143_v19, %v3836_v34  ;;  %v1269_v44 = vmul.f32 %v4150_v53, %v3849_v13  ;;  %v1086_v58 = vmul.f32 0.99, %v4044_v32  ;;  %v1201_v16 = vmul.f32 0.01, %v1185_v57 }
 0x44c   :  { %2692 = vmatpush3.xpose.msra.mxu1 %v1273_v20  ;;  %v1268_v23 = vmul.f32 %v4157_v3, %v3862_v31  ;;  %v1184_v35 = vmul.f32 %v4118_v25, %v1131_v29  ;;  %v1085_v20 = vmul.f32 0.99, %v4051_v7  ;;  %v1183_v41 = vmul.f32 %v4118_v25, %v1126_v14  ;;  %v1121_v22 = vpop.permute.xlu0 %1120 }
 0x44d   :  { %2693 = vmatprep.subr.mxu1 %v4740_v62  ;;  %v4164_v55 = vadd.f32 %v1202_v43, %v1086_v58  ;;  %v1182_v48 = vmul.f32 %v4118_v25, %v1121_v22 }
 0x44e   :  { %v4171_v46 = vadd.f32 %v1201_v16, %v1085_v20  ;;  %v1200_v10 = vmul.f32 0.01, %v1184_v35  ;;  %v1199_v47 = vmul.f32 0.01, %v1183_v41  ;;  %v1116_v36 = vpop.permute.xlu1 %1115 }
 0x44f   :  { %v1267_v32 = vmul.f32 %v4164_v55, %v3875_v37  ;;  %v1198_v42 = vmul.f32 0.01, %v1182_v48  ;;  %v1181_v52 = vmul.f32 %v4118_v25, %v1116_v36 }
 0x450   :  { %2694 = vmatpush3.xpose.msra.mxu1 %v1272_v6  ;;  %v1084_v6 = vmul.f32 0.99, %v4058_v28  ;;  %v1266_v7 = vmul.f32 %v4171_v46, %v3888_v17  ;;  %v1111_v27 = vpop.permute.xlu0 %1110 }
 0x451   :  { %2695 = vmatprep.subr.mxu1 %v4740_v62  ;;  %v1197_v59 = vmul.f32 0.01, %v1181_v52  ;;  %v1180_v9 = vmul.f32 %v4118_v25, %v1111_v27  ;;  %v1344_v52 = vld [vmem:[#allocation5 + $0x4] sm:$0x1] }
 0x452   :  { %v4178_v4 = vadd.f32 %v1200_v10, %v1084_v6  ;;  %v1106_v43 = vpop.permute.xlu1 %1105 }
 0x453   :  { %v1196_v58 = vmul.f32 0.01, %v1180_v9  ;;  %v1179_v29 = vmul.f32 %v4118_v25, %v1106_v43 }
 0x454   :  { %2696 = vmatpush3.xpose.msra.mxu1 %v1271_v11  ;;  %v1083_v11 = vmul.f32 0.99, %v4065_v24  ;;  %v1265_v28 = vmul.f32 %v4178_v4, %v3901_v26  ;;  %v1101_v16 = vpop.permute.xlu0 %1100 }
 0x455   :  { %2697 = vmatprep.subr.mxu1 %v4740_v62  ;;  %v1195_v20 = vmul.f32 0.01, %v1179_v29  ;;  %v1178_v14 = vmul.f32 %v4118_v25, %v1101_v16 }
 0x456   :  { %v4185_v45 = vadd.f32 %v1199_v47, %v1083_v11  ;;  %v1096_v10 = vpop.permute.xlu1 %1095  ;;  %v1077_v11 = vmul.f32 0.99, %v4106_v60 }
 0x457   :  { %v1194_v6 = vmul.f32 0.01, %v1178_v14  ;;  %v1177_v22 = vmul.f32 %v4118_v25, %v1096_v10 }
 0x458   :  { %2698 = vmatpush3.xpose.msra.mxu1 %v1270_v38  ;;  %v1082_v38 = vmul.f32 0.99, %v4072_v56  ;;  %v1264_v24 = vmul.f32 %v4185_v45, %v3914_v33  ;;  %v1441_v60 = vpop.permute.xlu0 %1440 }
 0x459   :  { %2699 = vmatprep.subr.mxu1 %v4740_v62  ;;  %v1193_v48 = vmul.f32 0.01, %v1177_v22 }
 0x45a   :  { %v4192_v12 = vadd.f32 %v1198_v42, %v1082_v38 }
 0x45b   :  { %v4226_v25 = vadd.f32 %v1193_v48, %v1077_v11 }
 0x45c   :  { %2700 = vmatpush3.xpose.msra.mxu1 %v1269_v44  ;;  %v1081_v44 = vmul.f32 0.99, %v4079_v2  ;;  %v1263_v56 = vmul.f32 %v4192_v12, %v3927_v18  ;;  %v1431_v43 = vpop.permute.xlu0 %1430 }
 0x45d   :  { %2701 = vmatprep.subr.mxu1 %v4740_v62 }
 0x45e   :  { %v4199_v57 = vadd.f32 %v1197_v59, %v1081_v44  ;;  %v1436_v59 = vpop.permute.xlu1 %1435 }
 0x460   :  { %2702 = vmatpush3.xpose.msra.mxu1 %v1268_v23  ;;  %v1080_v23 = vmul.f32 0.99, %v4086_v39  ;;  %v1262_v2 = vmul.f32 %v4199_v57, %v3940_v63 }
 0x461   :  { %2703 = vmatprep.subr.mxu1 %v4740_v62 }
 0x462   :  { %v4206_v35 = vadd.f32 %v1196_v58, %v1080_v23 }
 0x464   :  { %2704 = vmatpush3.xpose.msra.mxu1 %v1267_v32  ;;  %v1079_v32 = vmul.f32 0.99, %v4093_v30  ;;  %v1261_v39 = vmul.f32 %v4206_v35, %v3952_v1 }
 0x465   :  { %2705 = vmatprep.subr.mxu1 %v4740_v62 }
 0x466   :  { %v4213_v41 = vadd.f32 %v1195_v20, %v1079_v32  ;;  %v1426_v20 = vpop.permute.xlu1 %1425 }
 0x468   :  { %2706 = vmatpush3.xpose.msra.mxu1 %v1266_v7  ;;  %v1078_v7 = vmul.f32 0.99, %v4100_v49  ;;  %v1260_v47 = vmul.f32 %v4213_v41, %v3964_v5  ;;  %v1258_v49 = vmul.f32 %v4226_v25, %v3986_v8 }
 0x469   :  { %2707 = vmatprep.subr.mxu1 %v4740_v62 }
 0x46a   :  { %v4220_v30 = vadd.f32 %v1194_v6, %v1078_v7  ;;  %v1421_v6 = vpop.permute.xlu0 %1420  ;;  %v1416_v48 = vpop.permute.xlu1 %1415 }
 0x46c   :  { %2708 = vmatpush3.xpose.msra.mxu1 %v1265_v28  ;;  %v1259_v36 = vmul.f32 %v4220_v30, %v3975_v0  ;;  %v1225_v28 = vld [vmem:[%s4720_s0 + $0x4] sm:$0x1] }
 0x46d   :  { %2709 = vmatprep.subr.mxu1 %v4740_v62 }
 0x470   :  { %2710 = vmatpush3.xpose.msra.mxu1 %v1264_v24 }
 0x471   :  { %2711 = vmatprep.subr.mxu1 %v4740_v62 }
 0x474   :  { %2712 = vmatpush3.xpose.msra.mxu1 %v1263_v56  ;;  %v1362_v56 = vmul.f32 0.99, %v4124_v21  ;;  %v1360_v21 = vmul.f32 0.99, %v4136_v50 }
 0x475   :  { %2713 = vmatprep.subr.mxu1 %v4740_v62 }
 0x478   :  { %2714 = vmatpush3.xpose.msra.mxu1 %v1262_v2  ;;  %v1361_v2 = vmul.f32 0.99, %v4129_v61 }
 0x479   :  { %2715 = vmatprep.subr.mxu1 %v4740_v62 }
 0x47c   :  { %2716 = vmatpush3.xpose.msra.mxu1 %v1261_v39 }
 0x47d   :  { %2717 = vmatprep.subr.mxu1 %v4740_v62 }
 0x480   :  { %2718 = vmatpush3.xpose.msra.mxu1 %v1260_v47 }
 0x481   :  { %2719 = vmatprep.subr.mxu1 %v4740_v62 }
 0x484   :  { %2720 = vmatpush3.xpose.msra.mxu1 %v1259_v36 }
 0x485   :  { %2721 = vmatprep.subr.mxu1 %v4740_v62 }
 0x488   :  { %2722 = vmatpush3.xpose.msra.mxu1 %v1258_v49 }
 0x489   :  { %2761 = vmatprep.subr.mxu1 %v4740_v62 }
 0x48b   :  { %2724 = vmatmul.mubr.f32.vlgmr.msra.gmra.mxu1 %v1225_v28  ;;  %v1411_v28 = vpop.permute.xlu0 %1410 }
 0x48c   :  { %2793 = vmatprep.mubr.msk.f32.mxu1 %vm2912_vm0, %v4740_v62 }
 0x54b   :  { %v1340_v42 = vpop.f32.mrf.mxu1 }
 0x54c   :  { %v1345_v38 = vadd.f32 %v1344_v52, %v1340_v42 }
 0x54d   :  { %v2725_v27 = vpop.f32.mrf.mxu1 }
 0x54e   :  { %1346 = vst [vmem:[#allocation5 + $0x4] sm:$0x1] %v1345_v38  ;;  %v4238_v24 = vrot.slane %v1345_v38, %v3645_v51  ;;  %v1406_v38 = vpop.permute.xlu1 %1405 }
 0x550   :  { %v1462_v9 = vmul.f32 %v4238_v24, %v1441_v60  ;;  %v1461_v44 = vmul.f32 %v4238_v24, %v1436_v59  ;;  %v1460_v23 = vmul.f32 %v4238_v24, %v1431_v43  ;;  %v1459_v39 = vmul.f32 %v4238_v24, %v1426_v20 }
 0x551   :  { %v1458_v47 = vmul.f32 %v4238_v24, %v1421_v6  ;;  %v1457_v49 = vmul.f32 %v4238_v24, %v1416_v48  ;;  %v1456_v52 = vmul.f32 %v4238_v24, %v1411_v28 }
 0x552   :  { %v1478_v58 = vmul.f32 0.01, %v1462_v9  ;;  %v1477_v29 = vmul.f32 0.01, %v1461_v44  ;;  %v1476_v10 = vmul.f32 0.01, %v1460_v23  ;;  %v1455_v9 = vmul.f32 %v4238_v24, %v1406_v38  ;;  %v1401_v44 = vpop.permute.xlu0 %1400 }
 0x553   :  { %v1475_v61 = vmul.f32 0.01, %v1459_v39  ;;  %v1474_v36 = vmul.f32 0.01, %v1458_v47  ;;  %v1473_v42 = vmul.f32 0.01, %v1457_v49 }
 0x554   :  { %v4244_v16 = vadd.f32 %v1478_v58, %v1362_v56  ;;  %v4249_v32 = vadd.f32 %v1477_v29, %v1361_v2  ;;  %v4256_v7 = vadd.f32 %v1476_v10, %v1360_v21  ;;  %v1472_v59 = vmul.f32 0.01, %v1456_v52  ;;  %v1396_v29 = vpop.permute.xlu1 %1395 }
 0x555   :  { %v1471_v56 = vmul.f32 0.01, %v1455_v9  ;;  %v1454_v58 = vmul.f32 %v4238_v24, %v1401_v44  ;;  %v1453_v20 = vmul.f32 %v4238_v24, %v1396_v29 }
 0x556   :  { %v1543_v14 = vmul.f32 %v4244_v16, %v3796_v40  ;;  %v1542_v22 = vmul.f32 %v4249_v32, %v3810_v15  ;;  %v1359_v40 = vmul.f32 0.99, %v4143_v19  ;;  %v1541_v50 = vmul.f32 %v4256_v7, %v3823_v54 }
 0x557   :  { %v1358_v15 = vmul.f32 0.99, %v4150_v53  ;;  %v1357_v54 = vmul.f32 0.99, %v4157_v3  ;;  %v1470_v2 = vmul.f32 0.01, %v1454_v58 }
 0x558   :  { %2727 = vmatpush3.xpose.msra.mxu0 %v1543_v14  ;;  %v4263_v11 = vadd.f32 %v1475_v61, %v1359_v40  ;;  %v1391_v14 = vpop.permute.xlu0 %1390  ;;  %v1469_v39 = vmul.f32 0.01, %v1453_v20  ;;  %v1386_v6 = vpop.permute.xlu1 %1385  ;;  %v1614_v58 = vld [vmem:[#allocation5 + $0x5] sm:$0x1] }
 0x559   :  { %2728 = vmatprep.subr.mxu0 %v4740_v62  ;;  %v4270_v60 = vadd.f32 %v1474_v36, %v1358_v15  ;;  %v4277_v27 = vadd.f32 %v1473_v42, %v1357_v54  ;;  %v1452_v21 = vmul.f32 %v4238_v24, %v1391_v14  ;;  %v1451_v47 = vmul.f32 %v4238_v24, %v1386_v6 }
 0x55a   :  { %v1540_v19 = vmul.f32 %v4263_v11, %v3836_v34  ;;  %v1356_v34 = vmul.f32 0.99, %v4164_v55  ;;  %v1632_v14 = vmul.f32 0.99, %v4244_v16 }
 0x55b   :  { %v1539_v53 = vmul.f32 %v4270_v60, %v3849_v13  ;;  %v1538_v3 = vmul.f32 %v4277_v27, %v3862_v31  ;;  %v1355_v13 = vmul.f32 0.99, %v4171_v46  ;;  %v1354_v31 = vmul.f32 0.99, %v4178_v4 }
 0x55c   :  { %2729 = vmatpush3.xpose.msra.mxu0 %v1542_v22  ;;  %v4284_v43 = vadd.f32 %v1472_v59, %v1356_v34  ;;  %v1468_v61 = vmul.f32 0.01, %v1452_v21  ;;  %v1381_v40 = vpop.permute.xlu0 %1380  ;;  %v1376_v49 = vpop.permute.xlu1 %1375 }
 0x55d   :  { %2730 = vmatprep.subr.mxu0 %v4740_v62  ;;  %v4291_v23 = vadd.f32 %v1471_v56, %v1355_v13  ;;  %v4298_v10 = vadd.f32 %v1470_v2, %v1354_v31  ;;  %v1450_v36 = vmul.f32 %v4238_v24, %v1381_v40  ;;  %v1347_v56 = vmul.f32 0.99, %v4226_v25 }
 0x55e   :  { %v1537_v55 = vmul.f32 %v4284_v43, %v3875_v37  ;;  %v1353_v37 = vmul.f32 0.99, %v4185_v45 }
 0x55f   :  { %v1536_v46 = vmul.f32 %v4291_v23, %v3888_v17  ;;  %v1535_v4 = vmul.f32 %v4298_v10, %v3901_v26  ;;  %v1352_v17 = vmul.f32 0.99, %v4192_v12  ;;  %v1351_v26 = vmul.f32 0.99, %v4199_v57 }
 0x560   :  { %2731 = vmatpush3.xpose.msra.mxu0 %v1541_v50  ;;  %v4305_v22 = vadd.f32 %v1469_v39, %v1353_v37  ;;  %v1467_v50 = vmul.f32 0.01, %v1451_v47  ;;  %v1466_v28 = vmul.f32 0.01, %v1450_v36  ;;  %v1371_v42 = vpop.permute.xlu0 %1370  ;;  %v4367_v37 = vld [vmem:[%s4723_s3 + $0x78] sm:$0xff] }
 0x561   :  { %2732 = vmatprep.subr.mxu0 %v4740_v62  ;;  %v4312_v48 = vadd.f32 %v1468_v61, %v1352_v17  ;;  %v1448_v38 = vmul.f32 %v4238_v24, %v1371_v42 }
 0x562   :  { %v1534_v45 = vmul.f32 %v4305_v22, %v3914_v33  ;;  %v4319_v15 = vadd.f32 %v1467_v50, %v1351_v26  ;;  %v1350_v33 = vmul.f32 0.99, %v4206_v35  ;;  %v1630_v50 = vmul.f32 0.99, %v4256_v7 }
 0x563   :  { %v1533_v12 = vmul.f32 %v4312_v48, %v3927_v18  ;;  %v1349_v18 = vmul.f32 0.99, %v4213_v41  ;;  %v1464_v9 = vmul.f32 0.01, %v1448_v38  ;;  %v4404_v38 = vld [vmem:[%s4723_s3 + $0x60] sm:$0xff] }
 0x564   :  { %2733 = vmatpush3.xpose.msra.mxu0 %v1540_v19  ;;  %v1449_v19 = vmul.f32 %v4238_v24, %v1376_v49  ;;  %v1532_v57 = vmul.f32 %v4319_v15, %v3940_v63  ;;  %v4326_v52 = vadd.f32 %v1466_v28, %v1350_v33  ;;  %v1348_v63 = vmul.f32 0.99, %v4220_v30  ;;  %v4392_v28 = vld [vmem:[%s4723_s3 + $0x68] sm:$0xff] }
 0x565   :  { %2734 = vmatprep.subr.mxu0 %v4740_v62 }
 0x566   :  { %v1465_v54 = vmul.f32 0.01, %v1449_v19  ;;  %v1531_v35 = vmul.f32 %v4326_v52, %v3952_v1  ;;  %v4340_v41 = vadd.f32 %v1464_v9, %v1348_v63  ;;  %v1629_v19 = vmul.f32 0.99, %v4263_v11  ;;  %v4416_v63 = vld [vmem:[%s4723_s3 + $0x58] sm:$0xff] }
 0x568   :  { %2735 = vmatpush3.xpose.msra.mxu0 %v1539_v53  ;;  %v1366_v53 = vpop.permute.xlu1 %1365  ;;  %v4333_v59 = vadd.f32 %v1465_v54, %v1349_v18  ;;  %v1529_v1 = vmul.f32 %v4340_v41, %v3975_v0  ;;  %v1711_v0 = vpop.permute.xlu0 %1710  ;;  %v1628_v18 = vmul.f32 0.99, %v4270_v60 }
 0x569   :  { %2736 = vmatprep.subr.mxu0 %v4740_v62  ;;  %v1447_v34 = vmul.f32 %v4238_v24, %v1366_v53 }
 0x56a   :  { %v1530_v44 = vmul.f32 %v4333_v59, %v3964_v5  ;;  %v1495_v5 = vld [vmem:[%s4720_s0 + $0x5] sm:$0x1] }
 0x56c   :  { %2737 = vmatpush3.xpose.msra.mxu0 %v1538_v3  ;;  %v1463_v3 = vmul.f32 0.01, %v1447_v34  ;;  %v1701_v31 = vpop.permute.xlu0 %1700 }
 0x56d   :  { %2738 = vmatprep.subr.mxu0 %v4740_v62 }
 0x56e   :  { %v4346_v24 = vadd.f32 %v1463_v3, %v1347_v56 }
 0x570   :  { %2739 = vmatpush3.xpose.msra.mxu0 %v1537_v55  ;;  %v1528_v30 = vmul.f32 %v4346_v24, %v3986_v8  ;;  %v1706_v8 = vpop.permute.xlu1 %1705  ;;  %v1691_v36 = vpop.permute.xlu0 %1690 }
 0x571   :  { %2740 = vmatprep.subr.mxu0 %v4740_v62 }
 0x574   :  { %2741 = vmatpush3.xpose.msra.mxu0 %v1536_v46  ;;  %v1696_v61 = vpop.permute.xlu1 %1695  ;;  %v1681_v11 = vpop.permute.xlu0 %1680 }
 0x575   :  { %2742 = vmatprep.subr.mxu0 %v4740_v62 }
 0x578   :  { %2743 = vmatpush3.xpose.msra.mxu0 %v1535_v4  ;;  %v1631_v4 = vmul.f32 0.99, %v4249_v32  ;;  %v1686_v7 = vpop.permute.xlu1 %1685 }
 0x579   :  { %2744 = vmatprep.subr.mxu0 %v4740_v62 }
 0x57c   :  { %2745 = vmatpush3.xpose.msra.mxu0 %v1534_v45  ;;  %v4380_v45 = vld [vmem:[%s4723_s3 + $0x70] sm:$0xff]  ;;  %v1676_v60 = vpop.permute.xlu1 %1675 }
 0x57d   :  { %2746 = vmatprep.subr.mxu0 %v4740_v62 }
 0x580   :  { %2747 = vmatpush3.xpose.msra.mxu0 %v1533_v12 }
 0x581   :  { %2748 = vmatprep.subr.mxu0 %v4740_v62 }
 0x584   :  { %2749 = vmatpush3.xpose.msra.mxu0 %v1532_v57 }
 0x585   :  { %2750 = vmatprep.subr.mxu0 %v4740_v62 }
 0x588   :  { %2751 = vmatpush3.xpose.msra.mxu0 %v1531_v35 }
 0x589   :  { %2752 = vmatprep.subr.mxu0 %v4740_v62 }
 0x58c   :  { %2753 = vmatpush3.xpose.msra.mxu0 %v1530_v44  ;;  %v1627_v44 = vmul.f32 0.99, %v4277_v27  ;;  %v1671_v27 = vpop.permute.xlu0 %1670 }
 0x58d   :  { %2754 = vmatprep.subr.mxu0 %v4740_v62 }
 0x590   :  { %2755 = vmatpush3.xpose.msra.mxu0 %v1529_v1 }
 0x591   :  { %2756 = vmatprep.subr.mxu0 %v4740_v62 }
 0x594   :  { %2757 = vmatpush3.xpose.msra.mxu0 %v1528_v30 }
 0x595   :  { %2796 = vmatprep.subr.mxu0 %v4740_v62 }
 0x597   :  { %2759 = vmatmul.mubr.f32.vlgmr.msra.gmra.mxu0 %v1495_v5  ;;  %v4428_v5 = vld [vmem:[%s4723_s3 + $0x50] sm:$0xff] }
 0x598   :  { %2828 = vmatprep.mubr.msk.f32.mxu0 %vm2912_vm0, %v4740_v62 }
 0x657   :  { %v1610_v25 = vpop.f32.mrf.mxu0 }
 0x658   :  { %v1615_v13 = vadd.f32 %v1614_v58, %v1610_v25 }
 0x659   :  { %v2760_v29 = vpop.f32.mrf.mxu0 }
 0x65a   :  { %1616 = vst [vmem:[#allocation5 + $0x5] sm:$0x1] %v1615_v13  ;;  %v4358_v55 = vrot.slane %v1615_v13, %v3645_v51 }
 0x65c   :  { %v1732_v2 = vmul.f32 %v4358_v55, %v1711_v0  ;;  %v1731_v20 = vmul.f32 %v4358_v55, %v1706_v8  ;;  %v1730_v21 = vmul.f32 %v4358_v55, %v1701_v31  ;;  %v1729_v40 = vmul.f32 %v4358_v55, %v1696_v61  ;;  %v4440_v8 = vld [vmem:[%s4723_s3 + $0x48] sm:$0xff] }
 0x65d   :  { %v1728_v12 = vmul.f32 %v4358_v55, %v1691_v36  ;;  %v1727_v54 = vmul.f32 %v4358_v55, %v1686_v7  ;;  %v1726_v34 = vmul.f32 %v4358_v55, %v1681_v11  ;;  %v1725_v30 = vmul.f32 %v4358_v55, %v1676_v60  ;;  %v4488_v11 = vld [vmem:[%s4723_s3 + $0x28] sm:$0xff] }
 0x65e   :  { %v1748_v46 = vmul.f32 0.01, %v1732_v2  ;;  %v1747_v39 = vmul.f32 0.01, %v1731_v20  ;;  %v1746_v16 = vmul.f32 0.01, %v1730_v21  ;;  %v1724_v29 = vmul.f32 %v4358_v55, %v1671_v27 }
 0x65f   :  { %v1745_v49 = vmul.f32 0.01, %v1729_v40  ;;  %v1744_v57 = vmul.f32 0.01, %v1728_v12  ;;  %v1743_v9 = vmul.f32 0.01, %v1727_v54 }
 0x660   :  { %v4369_v6 = vadd.f32 %v1748_v46, %v1632_v14  ;;  %v4374_v17 = vadd.f32 %v1747_v39, %v1631_v4  ;;  %v4386_v26 = vadd.f32 %v1746_v16, %v1630_v50  ;;  %v1742_v1 = vmul.f32 0.01, %v1726_v34  ;;  %v4452_v39 = vld [vmem:[%s4723_s3 + $0x40] sm:$0xff]  ;;  %v4464_v40 = vld [vmem:[%s4723_s3 + $0x38] sm:$0xff] }
 0x661   :  { %v4398_v42 = vadd.f32 %v1745_v49, %v1629_v19  ;;  %v4410_v35 = vadd.f32 %v1744_v57, %v1628_v18  ;;  %v4422_v56 = vadd.f32 %v1743_v9, %v1627_v44  ;;  %v1626_v0 = vmul.f32 0.99, %v4284_v43  ;;  %v1666_v43 = vpop.permute.xlu1 %1665  ;;  %v4476_v19 = vld [vmem:[%s4723_s3 + $0x30] sm:$0xff] }
 0x662   :  { %v1813_v47 = vmul.f32 %v4367_v37, %v4369_v6  ;;  %v1812_v32 = vmul.f32 %v4380_v45, %v4374_v17  ;;  %v1811_v33 = vmul.f32 %v4392_v28, %v4386_v26  ;;  %v1741_v13 = vmul.f32 0.01, %v1725_v30 }
 0x663   :  { %v1810_v53 = vmul.f32 %v4404_v38, %v4398_v42  ;;  %v1809_v3 = vmul.f32 %v4416_v63, %v4410_v35  ;;  %v1808_v25 = vmul.f32 %v4428_v5, %v4422_v56  ;;  %v4434_v58 = vadd.f32 %v1742_v1, %v1626_v0 }
 0x664   :  { %2762 = vmatpush3.xpose.msra.mxu1 %v1813_v47  ;;  %v1625_v2 = vmul.f32 0.99, %v4291_v23  ;;  %v1740_v14 = vmul.f32 0.01, %v1724_v29  ;;  %v1723_v46 = vmul.f32 %v4358_v55, %v1666_v43  ;;  %v1624_v21 = vmul.f32 0.99, %v4298_v10  ;;  %v1661_v23 = vpop.permute.xlu0 %1660 }
 0x665   :  { %2763 = vmatprep.subr.mxu1 %v4740_v62  ;;  %v1807_v20 = vmul.f32 %v4440_v8, %v4434_v58  ;;  %v1722_v16 = vmul.f32 %v4358_v55, %v1661_v23  ;;  %v1623_v50 = vmul.f32 0.99, %v4305_v22  ;;  %v1656_v10 = vpop.permute.xlu1 %1655  ;;  %v1622_v7 = vmul.f32 0.99, %v4312_v48 }
 0x666   :  { %v4446_v31 = vadd.f32 %v1741_v13, %v1625_v2  ;;  %v4458_v61 = vadd.f32 %v1740_v14, %v1624_v21  ;;  %v1739_v47 = vmul.f32 0.01, %v1723_v46  ;;  %v1721_v12 = vmul.f32 %v4358_v55, %v1656_v10  ;;  %v4512_v13 = vld [vmem:[%s4723_s3 + $0x18] sm:$0xff]  ;;  %v4524_v46 = vld [vmem:[%s4723_s3 + $0x10] sm:$0xff] }
 0x667   :  { %v1738_v49 = vmul.f32 0.01, %v1722_v16  ;;  %v1620_v1 = vmul.f32 0.99, %v4326_v52  ;;  %v1619_v29 = vmul.f32 0.99, %v4333_v59 }
 0x668   :  { %2764 = vmatpush3.xpose.msra.mxu1 %v1812_v32  ;;  %v1806_v4 = vmul.f32 %v4452_v39, %v4446_v31  ;;  %v1805_v36 = vmul.f32 %v4464_v40, %v4458_v61  ;;  %v4470_v32 = vadd.f32 %v1739_v47, %v1623_v50  ;;  %v1651_v22 = vpop.permute.xlu0 %1650  ;;  %v1737_v54 = vmul.f32 0.01, %v1721_v12  ;;  %v4546_v50 = vld [vmem:[%s4723_s3] sm:$0xff] }
 0x669   :  { %2765 = vmatprep.subr.mxu1 %v4740_v62  ;;  %v4482_v57 = vadd.f32 %v1738_v49, %v1622_v7  ;;  %v1720_v18 = vmul.f32 %v4358_v55, %v1651_v22  ;;  %v1646_v48 = vpop.permute.xlu1 %1645  ;;  %v1618_v21 = vmul.f32 0.99, %v4340_v41  ;;  %v1617_v47 = vmul.f32 0.99, %v4346_v24  ;;  %v1765_v24 = vld [vmem:[%s4720_s0 + $0x6] sm:$0x1] }
 0x66a   :  { %v1719_v60 = vmul.f32 %v4358_v55, %v1646_v48  ;;  %v1884_v12 = vld [vmem:[#allocation5 + $0x6] sm:$0x1] }
 0x66b   :  { %v1803_v9 = vmul.f32 %v4488_v11, %v4482_v57  ;;  %v1736_v44 = vmul.f32 0.01, %v1720_v18 }
 0x66c   :  { %2766 = vmatpush3.xpose.msra.mxu1 %v1811_v33  ;;  %v1804_v33 = vmul.f32 %v4476_v19, %v4470_v32  ;;  %v1735_v27 = vmul.f32 0.01, %v1719_v60 }
 0x66d   :  { %2767 = vmatprep.subr.mxu1 %v4740_v62  ;;  %v4506_v0 = vadd.f32 %v1736_v44, %v1620_v1  ;;  %v1636_v52 = vpop.permute.xlu1 %1635 }
 0x66e   :  { %v4518_v43 = vadd.f32 %v1735_v27, %v1619_v29  ;;  %v1717_v14 = vmul.f32 %v4358_v55, %v1636_v52 }
 0x66f   :  { %v1801_v2 = vmul.f32 %v4512_v13, %v4506_v0 }
 0x670   :  { %2768 = vmatpush3.xpose.msra.mxu1 %v1810_v53  ;;  %v1621_v53 = vmul.f32 0.99, %v4319_v15  ;;  %v1641_v15 = vpop.permute.xlu0 %1640  ;;  %v1800_v59 = vmul.f32 %v4524_v46, %v4518_v43 }
 0x671   :  { %2769 = vmatprep.subr.mxu1 %v4740_v62 }
 0x672   :  { %v4494_v34 = vadd.f32 %v1737_v54, %v1621_v53  ;;  %v1976_v54 = vpop.permute.xlu1 %1975 }
 0x674   :  { %2770 = vmatpush3.xpose.msra.mxu1 %v1809_v3  ;;  %v4500_v3 = vld [vmem:[%s4723_s3 + $0x20] sm:$0xff] }
 0x675   :  { %2771 = vmatprep.subr.mxu1 %v4740_v62  ;;  %v1802_v30 = vmul.f32 %v4500_v3, %v4494_v34 }
 0x676   :  { %v1966_v27 = vpop.permute.xlu1 %1965 }
 0x678   :  { %2772 = vmatpush3.xpose.msra.mxu1 %v1808_v25  ;;  %v1718_v25 = vmul.f32 %v4358_v55, %v1641_v15  ;;  %v4535_v55 = vld [vmem:[%s4723_s3 + $0x8] sm:$0xff] }
 0x679   :  { %2773 = vmatprep.subr.mxu1 %v4740_v62 }
 0x67c   :  { %2774 = vmatpush3.xpose.msra.mxu1 %v1807_v20  ;;  %v1734_v20 = vmul.f32 0.01, %v1718_v25 }
 0x67d   :  { %2775 = vmatprep.subr.mxu1 %v4740_v62 }
 0x67e   :  { %v4530_v23 = vadd.f32 %v1734_v20, %v1618_v21 }
 0x680   :  { %2776 = vmatpush3.xpose.msra.mxu1 %v1806_v4  ;;  %v1733_v4 = vmul.f32 0.01, %v1717_v14  ;;  %v1799_v41 = vmul.f32 %v4535_v55, %v4530_v23 }
 0x681   :  { %2777 = vmatprep.subr.mxu1 %v4740_v62 }
 0x682   :  { %v4541_v16 = vadd.f32 %v1733_v4, %v1617_v47  ;;  %v1956_v4 = vpop.permute.xlu1 %1955 }
 0x684   :  { %2778 = vmatpush3.xpose.msra.mxu1 %v1805_v36  ;;  %v1798_v10 = vmul.f32 %v4546_v50, %v4541_v16  ;;  %v1981_v36 = vpop.permute.xlu0 %1980 }
 0x685   :  { %2779 = vmatprep.subr.mxu1 %v4740_v62 }
 0x688   :  { %2780 = vmatpush3.xpose.msra.mxu1 %v1804_v33  ;;  %v1971_v48 = vpop.permute.xlu0 %1970 }
 0x689   :  { %2781 = vmatprep.subr.mxu1 %v4740_v62 }
 0x68c   :  { %2782 = vmatpush3.xpose.msra.mxu1 %v1803_v9  ;;  %v1902_v9 = vmul.f32 0.99, %v4369_v6  ;;  %v1900_v6 = vmul.f32 0.99, %v4386_v26  ;;  %v1961_v20 = vpop.permute.xlu0 %1960 }
 0x68d   :  { %2783 = vmatprep.subr.mxu1 %v4740_v62 }
 0x690   :  { %2784 = vmatpush3.xpose.msra.mxu1 %v1802_v30  ;;  %v1901_v30 = vmul.f32 0.99, %v4374_v17 }
 0x691   :  { %2785 = vmatprep.subr.mxu1 %v4740_v62 }
 0x694   :  { %2786 = vmatpush3.xpose.msra.mxu1 %v1801_v2 }
 0x695   :  { %2787 = vmatprep.subr.mxu1 %v4740_v62 }
 0x698   :  { %2788 = vmatpush3.xpose.msra.mxu1 %v1800_v59 }
 0x699   :  { %2789 = vmatprep.subr.mxu1 %v4740_v62 }
 0x69c   :  { %2790 = vmatpush3.xpose.msra.mxu1 %v1799_v41 }
 0x69d   :  { %2791 = vmatprep.subr.mxu1 %v4740_v62 }
 0x6a0   :  { %2792 = vmatpush3.xpose.msra.mxu1 %v1798_v10 }
 0x6a3   :  { %2794 = vmatmul.mubr.f32.vlgmr.msra.gmra.mxu1 %v1765_v24  ;;  %v1951_v24 = vpop.permute.xlu0 %1950 }
 0x763   :  { %v1880_v49 = vpop.f32.mrf.mxu1 }
 0x764   :  { %v1885_v7 = vadd.f32 %v1884_v12, %v1880_v49 }
 0x765   :  { %v2795_v22 = vpop.f32.mrf.mxu1 }
 0x766   :  { %1886 = vst [vmem:[#allocation5 + $0x6] sm:$0x1] %v1885_v7  ;;  %v4555_v33 = vrot.slane %v1885_v7, %v3645_v51  ;;  %v1946_v7 = vpop.permute.xlu1 %1945 }
 0x768   :  { %v2002_v18 = vmul.f32 %v4555_v33, %v1981_v36  ;;  %v2001_v53 = vmul.f32 %v4555_v33, %v1976_v54  ;;  %v2000_v1 = vmul.f32 %v4555_v33, %v1971_v48  ;;  %v1999_v2 = vmul.f32 %v4555_v33, %v1966_v27 }
 0x769   :  { %v1998_v59 = vmul.f32 %v4555_v33, %v1961_v20  ;;  %v1997_v10 = vmul.f32 %v4555_v33, %v1956_v4  ;;  %v1996_v12 = vmul.f32 %v4555_v33, %v1951_v24 }
 0x76a   :  { %v2018_v44 = vmul.f32 0.01, %v2002_v18  ;;  %v2017_v60 = vmul.f32 0.01, %v2001_v53  ;;  %v2016_v52 = vmul.f32 0.01, %v2000_v1  ;;  %v1995_v18 = vmul.f32 %v4555_v33, %v1946_v7  ;;  %v1941_v53 = vpop.permute.xlu0 %1940 }
 0x76b   :  { %v2015_v17 = vmul.f32 0.01, %v1999_v2  ;;  %v2014_v41 = vmul.f32 0.01, %v1998_v59  ;;  %v2013_v49 = vmul.f32 0.01, %v1997_v10 }
 0x76c   :  { %v4561_v15 = vadd.f32 %v2018_v44, %v1902_v9  ;;  %v4566_v29 = vadd.f32 %v2017_v60, %v1901_v30  ;;  %v4573_v21 = vadd.f32 %v2016_v52, %v1900_v6  ;;  %v2012_v54 = vmul.f32 0.01, %v1996_v12  ;;  %v1936_v60 = vpop.permute.xlu1 %1935 }
 0x76d   :  { %v2011_v9 = vmul.f32 0.01, %v1995_v18  ;;  %v1994_v44 = vmul.f32 %v4555_v33, %v1941_v53  ;;  %v1993_v27 = vmul.f32 %v4555_v33, %v1936_v60  ;;  %v1888_v53 = vmul.f32 0.99, %v4530_v23 }
 0x76e   :  { %v2083_v25 = vmul.f32 %v4561_v15, %v4367_v37  ;;  %v2082_v14 = vmul.f32 %v4566_v29, %v4380_v45  ;;  %v1899_v37 = vmul.f32 0.99, %v4398_v42  ;;  %v2081_v26 = vmul.f32 %v4573_v21, %v4392_v28 }
 0x76f   :  { %v1898_v45 = vmul.f32 0.99, %v4410_v35  ;;  %v1897_v28 = vmul.f32 0.99, %v4422_v56  ;;  %v2010_v30 = vmul.f32 0.01, %v1994_v44 }
 0x770   :  { %2797 = vmatpush3.xpose.msra.mxu0 %v2083_v25  ;;  %v4580_v47 = vadd.f32 %v2015_v17, %v1899_v37  ;;  %v1931_v25 = vpop.permute.xlu0 %1930  ;;  %v2009_v2 = vmul.f32 0.01, %v1993_v27  ;;  %v1926_v20 = vpop.permute.xlu1 %1925 }
 0x771   :  { %2798 = vmatprep.subr.mxu0 %v4740_v62  ;;  %v4587_v36 = vadd.f32 %v2014_v41, %v1898_v45  ;;  %v4594_v22 = vadd.f32 %v2013_v49, %v1897_v28  ;;  %v1992_v6 = vmul.f32 %v4555_v33, %v1931_v25  ;;  %v1991_v59 = vmul.f32 %v4555_v33, %v1926_v20 }
 0x772   :  { %v2080_v42 = vmul.f32 %v4580_v47, %v4404_v38  ;;  %v1896_v38 = vmul.f32 0.99, %v4434_v58  ;;  %v4666_v20 = vmul.f32 0.99, %v4573_v21 }
 0x773   :  { %v2079_v35 = vmul.f32 %v4587_v36, %v4416_v63  ;;  %v2078_v56 = vmul.f32 %v4594_v22, %v4428_v5  ;;  %v1895_v63 = vmul.f32 0.99, %v4446_v31  ;;  %v1894_v5 = vmul.f32 0.99, %v4458_v61 }
 0x774   :  { %2799 = vmatpush3.xpose.msra.mxu0 %v2082_v14  ;;  %v4601_v48 = vadd.f32 %v2012_v54, %v1896_v38  ;;  %v2008_v17 = vmul.f32 0.01, %v1992_v6  ;;  %v1921_v37 = vpop.permute.xlu0 %1920  ;;  %v1916_v10 = vpop.permute.xlu1 %1915  ;;  %v2154_v6 = vld [vmem:[#allocation5 + $0x7] sm:$0x1] }
 0x775   :  { %2800 = vmatprep.subr.mxu0 %v4740_v62  ;;  %v4608_v1 = vadd.f32 %v2011_v9, %v1895_v63  ;;  %v4615_v52 = vadd.f32 %v2010_v30, %v1894_v5  ;;  %v1990_v41 = vmul.f32 %v4555_v33, %v1921_v37 }
 0x776   :  { %v2077_v58 = vmul.f32 %v4601_v48, %v4440_v8  ;;  %v1893_v8 = vmul.f32 0.99, %v4470_v32 }
 0x777   :  { %v2076_v31 = vmul.f32 %v4608_v1, %v4452_v39  ;;  %v2075_v61 = vmul.f32 %v4615_v52, %v4464_v40  ;;  %v1892_v39 = vmul.f32 0.99, %v4482_v57  ;;  %v1891_v40 = vmul.f32 0.99, %v4494_v34 }
 0x778   :  { %2801 = vmatpush3.xpose.msra.mxu0 %v2081_v26  ;;  %v4622_v14 = vadd.f32 %v2009_v2, %v1893_v8  ;;  %v2007_v26 = vmul.f32 0.01, %v1991_v59  ;;  %v2006_v24 = vmul.f32 0.01, %v1990_v41  ;;  %v1911_v49 = vpop.permute.xlu0 %1910  ;;  %v4663_v8 = vmul.f32 0.99, %v4566_v29 }
 0x779   :  { %2802 = vmatprep.subr.mxu0 %v4740_v62  ;;  %v4629_v4 = vadd.f32 %v2008_v17, %v1892_v39  ;;  %v1988_v7 = vmul.f32 %v4555_v33, %v1911_v49  ;;  %v4672_v59 = vmul.f32 0.99, %v4587_v36  ;;  %v4675_v39 = vmul.f32 0.99, %v4594_v22 }
 0x77a   :  { %v2074_v32 = vmul.f32 %v4622_v14, %v4476_v19  ;;  %v4636_v45 = vadd.f32 %v2007_v26, %v1891_v40  ;;  %v1890_v19 = vmul.f32 0.99, %v4506_v0  ;;  %v4681_v26 = vmul.f32 0.99, %v4608_v1 }
 0x77b   :  { %v2073_v57 = vmul.f32 %v4629_v4, %v4488_v11  ;;  %v1889_v11 = vmul.f32 0.99, %v4518_v43  ;;  %v2004_v0 = vmul.f32 0.01, %v1988_v7  ;;  %v1887_v43 = vmul.f32 0.99, %v4541_v16 }
 0x77c   :  { %2803 = vmatpush3.xpose.msra.mxu0 %v2080_v42  ;;  %v1989_v42 = vmul.f32 %v4555_v33, %v1916_v10  ;;  %v2072_v34 = vmul.f32 %v4636_v45, %v4500_v3  ;;  %v2022_v12 = vadd.f32 %v2006_v24, %v1890_v19  ;;  %v2176_v23 = vpop.permute.xlu0 %2175  ;;  %v4684_v21 = vmul.f32 0.99, %v4615_v52 }
 0x77d   :  { %2804 = vmatprep.subr.mxu0 %v4740_v62  ;;  %v4691_v22 = vmul.f32 0.99, %v4629_v4 }
 0x77e   :  { %v2005_v28 = vmul.f32 0.01, %v1989_v42  ;;  %v2071_v54 = vmul.f32 %v2022_v12, %v4512_v13  ;;  %v2160_v41 = vmul.f32 0.99, %v2022_v12 }
 0x780   :  { %2805 = vmatpush3.xpose.msra.mxu0 %v2079_v35  ;;  %v1906_v35 = vpop.permute.xlu1 %1905  ;;  %v2021_v18 = vadd.f32 %v2005_v28, %v1889_v11  ;;  %v2186_v60 = vpop.permute.xlu0 %2185 }
 0x781   :  { %2806 = vmatprep.subr.mxu0 %v4740_v62  ;;  %v1987_v38 = vmul.f32 %v4555_v33, %v1906_v35 }
 0x782   :  { %v2070_v3 = vmul.f32 %v2021_v18, %v4524_v46  ;;  %v2035_v46 = vld [vmem:[%s4720_s0 + $0x7] sm:$0x1]  ;;  %v2159_v40 = vmul.f32 0.99, %v2021_v18 }
 0x783   :  { %v2003_v9 = vmul.f32 0.01, %v1987_v38 }
 0x784   :  { %2807 = vmatpush3.xpose.msra.mxu0 %v2078_v56  ;;  %v2020_v56 = vadd.f32 %v2004_v0, %v1888_v53  ;;  %v2181_v63 = vpop.permute.xlu1 %2180 }
 0x785   :  { %2808 = vmatprep.subr.mxu0 %v4740_v62  ;;  %v2019_v44 = vadd.f32 %v2003_v9, %v1887_v43 }
 0x786   :  { %v2069_v13 = vmul.f32 %v2020_v56, %v4535_v55  ;;  %v2158_v24 = vmul.f32 0.99, %v2020_v56 }
 0x787   :  { %v2068_v33 = vmul.f32 %v2019_v44, %v4546_v50  ;;  %v4660_v50 = vmul.f32 0.99, %v4561_v15  ;;  %v4678_v15 = vmul.f32 0.99, %v4601_v48  ;;  %v2161_v48 = vmul.f32 0.99, %v4636_v45 }
 0x788   :  { %2809 = vmatpush3.xpose.msra.mxu0 %v2077_v58  ;;  %v2191_v16 = vpop.permute.xlu1 %2190  ;;  %v2196_v58 = vpop.permute.xlu0 %2195  ;;  %v2157_v42 = vmul.f32 0.99, %v2019_v44 }
 0x789   :  { %2810 = vmatprep.subr.mxu0 %v4740_v62 }
 0x78c   :  { %2811 = vmatpush3.xpose.msra.mxu0 %v2076_v31  ;;  %v2201_v30 = vpop.permute.xlu1 %2200  ;;  %v2206_v27 = vpop.permute.xlu0 %2205 }
 0x78d   :  { %2812 = vmatprep.subr.mxu0 %v4740_v62 }
 0x790   :  { %2813 = vmatpush3.xpose.msra.mxu0 %v2075_v61  ;;  %v2211_v55 = vpop.permute.xlu1 %2210  ;;  %v2216_v5 = vpop.permute.xlu0 %2215  ;;  %v4669_v61 = vmul.f32 0.99, %v4580_v47  ;;  %v4687_v47 = vmul.f32 0.99, %v4622_v14 }
 0x791   :  { %2814 = vmatprep.subr.mxu0 %v4740_v62 }
 0x794   :  { %2815 = vmatpush3.xpose.msra.mxu0 %v2074_v32  ;;  %v2221_v25 = vpop.permute.xlu1 %2220  ;;  %v2226_v31 = vpop.permute.xlu0 %2225 }
 0x795   :  { %2816 = vmatprep.subr.mxu0 %v4740_v62 }
 0x798   :  { %2817 = vmatpush3.xpose.msra.mxu0 %v2073_v57  ;;  %v2236_v32 = vpop.permute.xlu0 %2235 }
 0x799   :  { %2818 = vmatprep.subr.mxu0 %v4740_v62 }
 0x79c   :  { %2819 = vmatpush3.xpose.msra.mxu0 %v2072_v34  ;;  %v2246_v11 = vpop.permute.xlu0 %2245 }
 0x79d   :  { %2820 = vmatprep.subr.mxu0 %v4740_v62 }
 0x7a0   :  { %2821 = vmatpush3.xpose.msra.mxu0 %v2071_v54 }
 0x7a1   :  { %2822 = vmatprep.subr.mxu0 %v4740_v62 }
 0x7a4   :  { %2823 = vmatpush3.xpose.msra.mxu0 %v2070_v3 }
 0x7a5   :  { %2824 = vmatprep.subr.mxu0 %v4740_v62 }
 0x7a8   :  { %2825 = vmatpush3.xpose.msra.mxu0 %v2069_v13 }
 0x7a9   :  { %2826 = vmatprep.subr.mxu0 %v4740_v62  ;;  %v2231_v62 = vpop.permute.xlu1 %2230 }
 0x7ac   :  { %2827 = vmatpush3.xpose.msra.mxu0 %v2068_v33 }
 0x7ad   :  { %v2241_v29 = vpop.permute.xlu1 %2240 }
 0x7af   :  { %2829 = vmatmul.mubr.f32.vlgmr.msra.gmra.mxu0 %v2035_v46 }
 0x7b1   :  { %v2251_v35 = vpop.permute.xlu1 %2250 }
 0x86f   :  { %v2150_v2 = vpop.f32.mrf.mxu0 }
 0x870   :  { %v2155_v17 = vadd.f32 %v2154_v6, %v2150_v2 }
 0x871   :  { %v2830_v37 = vpop.f32.mrf.mxu0 }
 0x872   :  { %2156 = vst [vmem:[#allocation5 + $0x7] sm:$0x1] %v2155_v17  ;;  %v2256_v36 = vrot.slane %v2155_v17, %v3645_v51  ;;  %v2362_v51 = vld [vmem:[%s4725_s5] ss:$0 sm:$0xff]  ;;  %s2861_s5 = scalar_lea.vmem %s2338_s20, 128 }
 0x873   :  { %p2862_p5 = scmp.ne.s32.totalorder %s2338_s20, %s2861_s5  ;;  %p2867_p7 = scmp.lt.s32.totalorder %s2861_s5, %s2861_s5 }
 0x874   :  { %v2257_v10 = vmul.f32 %v2256_v36, %v2176_v23  ;;  %v2258_v57 = vmul.f32 %v2256_v36, %v2181_v63  ;;  %v2259_v1 = vmul.f32 %v2256_v36, %v2186_v60  ;;  %v2260_v52 = vmul.f32 %v2256_v36, %v2191_v16 }
 0x875   :  { %v2261_v19 = vmul.f32 %v2256_v36, %v2196_v58  ;;  %v2262_v49 = vmul.f32 %v2256_v36, %v2201_v30  ;;  %v2263_v14 = vmul.f32 %v2256_v36, %v2206_v27  ;;  %v2264_v34 = vmul.f32 %v2256_v36, %v2211_v55  ;;  %p2868_p8 = por %p2867_p7, %p2866_p6 }
 0x876   :  { %v2265_v28 = vmul.f32 %v2256_v36, %v2216_v5  ;;  %v2266_v4 = vmul.f32 %v2256_v36, %v2221_v25  ;;  %v2267_v45 = vmul.f32 %v2256_v36, %v2226_v31  ;;  %v2268_v12 = vmul.f32 %v2256_v36, %v2231_v62 }
 0x877   :  { %v2269_v7 = vmul.f32 %v2256_v36, %v2236_v32  ;;  %v2270_v54 = vmul.f32 %v2256_v36, %v2241_v29  ;;  %v2273_v18 = vmul.f32 0.01, %v2257_v10  ;;  %v2274_v0 = vmul.f32 0.01, %v2258_v57  ;;  %p2869_p9 = pnand %p2868_p8, %p2862_p5 }
 0x878   :  { %v2275_v38 = vmul.f32 0.01, %v2259_v1  ;;  %v2271_v3 = vmul.f32 %v2256_v36, %v2246_v11  ;;  %v2272_v56 = vmul.f32 %v2256_v36, %v2251_v35  ;;  %v2276_v9 = vmul.f32 0.01, %v2260_v52 }
 0x879   :  { %v2321_v53 = vld [vmem:[#allocation5] sm:$0xff]  ;;  %v2277_v43 = vmul.f32 0.01, %v2261_v19  ;;  %v2278_v44 = vmul.f32 0.01, %v2262_v49  ;;  %v2289_v16 = vadd.f32 %v2273_v18, %v2157_v42  ;;  %v2290_v55 = vadd.f32 %v2274_v0, %v2158_v24 }
 0x87a   :  { %v2329_v13 = vadd.f32 %v2362_v51, %v2321_v53  ;;  %v2279_v33 = vmul.f32 0.01, %v2263_v14  ;;  %v2280_v46 = vmul.f32 0.01, %v2264_v34  ;;  %v2281_v23 = vmul.f32 0.01, %v2265_v28 }
 0x87b   :  { %v2282_v63 = vmul.f32 0.01, %v2266_v4  ;;  %v2283_v60 = vmul.f32 0.01, %v2267_v45  ;;  %v2284_v58 = vmul.f32 0.01, %v2268_v12 }
 0x87c   :  { %2330 = vst [vmem:[#allocation5] sm:$0xff] %v2329_v13  ;;  %v2285_v30 = vmul.f32 0.01, %v2269_v7  ;;  %v2286_v27 = vmul.f32 0.01, %v2270_v54 }
 0x87d   :  { %2872 = shalt.err (!%p2869_p9)
}
 0x87e   :  { %2340 = dma.vmem_to_hbm [thread:$0]  %s2338_s20, 128, %s4726_s6, [#allocation4]   ;;  %v2287_v5 = vmul.f32 0.01, %v2271_v3  ;;  %v2288_v25 = vmul.f32 0.01, %v2272_v56  ;;  %v2291_v31 = vadd.f32 %v2275_v38, %v2159_v40  ;;  %v2292_v62 = vadd.f32 %v2276_v9, %v2160_v41 }
 0x87f   :  { %2305 = vst [vmem:[#allocation6] sm:$0xff] %v2289_v16  ;;  %v2293_v2 = vadd.f32 %v2277_v43, %v2161_v48  ;;  %v2294_v6 = vadd.f32 %v2278_v44, %v4691_v22  ;;  %v2295_v17 = vadd.f32 %v2279_v33, %v4687_v47  ;;  %v2296_v37 = vadd.f32 %v2280_v46, %v4684_v21  ;;  %s2881_s6 = scalar_lea.vmem %s2347_s22, 2048  ;;  %p2886_p11 = scmp.lt.s32.totalorder %s2347_s22, %s2347_s22 }
 0x880   :  { %2306 = vst [vmem:[#allocation6 + $0x8] sm:$0xff] %v2290_v55  ;;  %v2297_v32 = vadd.f32 %v2281_v23, %v4681_v26  ;;  %v2298_v29 = vadd.f32 %v2282_v63, %v4678_v15  ;;  %v2299_v36 = vadd.f32 %v2283_v60, %v4675_v39  ;;  %v2300_v10 = vadd.f32 %v2284_v58, %v4672_v59  ;;  %p2882_p10 = scmp.ne.s32.totalorder %s2347_s22, %s2881_s6  ;;  %p2887_p12 = scmp.lt.s32.totalorder %s2881_s6, %s2881_s6 }
 0x881   :  { %2307 = vst [vmem:[#allocation6 + $0x10] sm:$0xff] %v2291_v31  ;;  %2308 = vst [vmem:[#allocation6 + $0x18] sm:$0xff] %v2292_v62  ;;  %v2301_v48 = vadd.f32 %v2285_v30, %v4669_v61  ;;  %v2302_v22 = vadd.f32 %v2286_v27, %v4666_v20  ;;  %v2303_v47 = vadd.f32 %v2287_v5, %v4663_v8 }
 0x882   :  { %v2304_v21 = vadd.f32 %v2288_v25, %v4660_v50  ;;  %2309 = vst [vmem:[#allocation6 + $0x20] sm:$0xff] %v2293_v2  ;;  %2310 = vst [vmem:[#allocation6 + $0x28] sm:$0xff] %v2294_v6  ;;  %p2888_p13 = por %p2887_p12, %p2886_p11 }
 0x883   :  { %2311 = vst [vmem:[#allocation6 + $0x30] sm:$0xff] %v2295_v17  ;;  %2312 = vst [vmem:[#allocation6 + $0x38] sm:$0xff] %v2296_v37 }
 0x884   :  { %2313 = vst [vmem:[#allocation6 + $0x40] sm:$0xff] %v2297_v32  ;;  %2314 = vst [vmem:[#allocation6 + $0x48] sm:$0xff] %v2298_v29  ;;  %p2889_p0 = pnand %p2888_p13, %p2882_p10 }
 0x885   :  { %2315 = vst [vmem:[#allocation6 + $0x50] sm:$0xff] %v2299_v36  ;;  %2316 = vst [vmem:[#allocation6 + $0x58] sm:$0xff] %v2300_v10 }
 0x886   :  { %2317 = vst [vmem:[#allocation6 + $0x60] sm:$0xff] %v2301_v48  ;;  %2318 = vst [vmem:[#allocation6 + $0x68] sm:$0xff] %v2302_v22 }
 0x887   :  { %2319 = vst [vmem:[#allocation6 + $0x70] sm:$0xff] %v2303_v47  ;;  %2320 = vst [vmem:[#allocation6 + $0x78] sm:$0xff] %v2304_v21 }
 0x888   :  { %2892 = shalt.err (!%p2889_p0)
}
 0x889   :  { %2352 = dma.vmem_to_hbm [thread:$0]  %s2347_s22, 2048, %s4727_s7, [#allocation7], %s2908_s27, %s2908_s27, %s2909_s28  }
 0x88a   :  { %2903 = dma.done.wait [#allocation4], 128  }
 0x88b   :  { %2904 = vsyncadd [#allocation4], 4294967168 }
 0x88c   :  { %2905 = dma.done.wait [#allocation7], 2048  }
 0x88d   :  { %2906 = vsyncadd [#allocation7], 4294965248 }
 0x88e   :  { %2359 = vsyncpa [#allocation3], 1 }
 0x88f   :  { %2360 = vsyncpa [#allocation4], 1 }
 0x890   :  { %2361 = vsyncpa [#allocation7], 1 }

</bundles_post_ra>
